<compile_context>
chip_gen: v7x
topology: tpu7x:2x2x1
jax: 0.10.0
libtpu: 0.0.40
codegen_flags: <defaults>
</compile_context>

<pallas_src>
import functools
import math

import jax
import jax.numpy as jnp
from jax.experimental import pallas as pl
from jax.experimental.pallas import tpu as pltpu

LANE = 128


def _round_up(x, m):
    return (x + m - 1) // m * m


def _vmem():
    return pl.BlockSpec(memory_space=pltpu.MemorySpace.VMEM)


# ------------------------------- fused kernel ------------------------------- #

def _make_decoder_kernel(n_layers):
    def kernel(*refs):
        ids_ref, emb_ref, h_ref, c_ref = refs[:4]            # SMEM, HBM, VMEM, VMEM
        layer_refs = refs[4:4 + 2 * n_layers]                 # (w_cat, b) per layer
        wfc_ref = refs[4 + 2 * n_layers]                       # (Hp, Vp)
        bfc_ref = refs[5 + 2 * n_layers]                       # (1, Vp)
        pred_ref, h_out_ref, c_out_ref = refs[6 + 2 * n_layers:9 + 2 * n_layers]
        x_buf = refs[9 + 2 * n_layers]                         # VMEM (B, Ep) scratch
        sem = refs[10 + 2 * n_layers]                          # DMA sems (B,)

        B = x_buf.shape[0]
        Hp = h_ref.shape[-1]

        # --- Embedding gather: one row DMA per token; ids are scalars in SMEM. ---
        for b in range(B):
            pltpu.make_async_copy(
                emb_ref.at[pl.ds(ids_ref[b], 1), :],
                x_buf.at[pl.ds(b, 1), :],
                sem.at[b],
            ).start()
        for b in range(B):
            pltpu.make_async_copy(
                emb_ref.at[pl.ds(ids_ref[b], 1), :],
                x_buf.at[pl.ds(b, 1), :],
                sem.at[b],
            ).wait()

        x = x_buf[...]                       # (B, Ep); dropout(embedded): identity (eval)

        for layer in range(n_layers):
            w_ref = layer_refs[2 * layer]     # (in_p + Hp, 4*Hp)   [W_ih^T ; W_hh^T]
            b_ref = layer_refs[2 * layer + 1] # (1, 4*Hp)           b_ih + b_hh
            h_prev = h_ref[layer]             # (B, Hp)
            c_prev = c_ref[layer]             # (B, Hp)

            xh = jnp.concatenate([x, h_prev], axis=-1)           # (B, in_p + Hp)
            gates = (jnp.dot(xh, w_ref[...], preferred_element_type=jnp.float32)
                     + b_ref[...])                               # (B, 4*Hp)

            # 128-lane-aligned gate slices (Hp is a multiple of 128).
            i_g = jax.nn.sigmoid(gates[:, 0 * Hp:1 * Hp])
            f_g = jax.nn.sigmoid(gates[:, 1 * Hp:2 * Hp])
            g_g = jnp.tanh(gates[:, 2 * Hp:3 * Hp])
            o_g = jax.nn.sigmoid(gates[:, 3 * Hp:4 * Hp])

            c_new = f_g * c_prev + i_g * g_g
            h_new = o_g * jnp.tanh(c_new)

            h_out_ref[layer] = h_new
            c_out_ref[layer] = c_new
            x = h_new                          # inter-layer dropout: identity (eval)

        pred_ref[...] = (jnp.dot(x, wfc_ref[...], preferred_element_type=jnp.float32)
                         + bfc_ref[...])
    return kernel


# ------------------------------ parameter packing --------------------------- #

def init_decoder_params(key, output_dim, emb_dim, hid_dim, n_layers):
    """Raw params in PyTorch layout (embedding (V,E), w_ih (4H,in), w_hh (4H,H), ...)."""
    params = {}
    k_emb, key = jax.random.split(key)
    params["embedding"] = jax.random.normal(k_emb, (output_dim, emb_dim), jnp.float32)

    bound = 1.0 / math.sqrt(hid_dim)
    lstm = []
    for layer in range(n_layers):
        in_dim = emb_dim if layer == 0 else hid_dim
        k1, k2, k3, k4, key = jax.random.split(key, 5)
        lstm.append({
            "w_ih": jax.random.uniform(k1, (4 * hid_dim, in_dim), jnp.float32, -bound, bound),
            "w_hh": jax.random.uniform(k2, (4 * hid_dim, hid_dim), jnp.float32, -bound, bound),
            "b_ih": jax.random.uniform(k3, (4 * hid_dim,), jnp.float32, -bound, bound),
            "b_hh": jax.random.uniform(k4, (4 * hid_dim,), jnp.float32, -bound, bound),
        })
    params["lstm"] = lstm

    k5, k6, _ = jax.random.split(key, 3)
    params["fc_w"] = jax.random.uniform(k5, (output_dim, hid_dim), jnp.float32, -bound, bound)
    params["fc_b"] = jax.random.uniform(k6, (output_dim,), jnp.float32, -bound, bound)
    return params


def pack_decoder_params(raw, output_dim, emb_dim, hid_dim, n_layers):
    """Fuse + transpose + lane-pad params for the kernel.

    Per layer: w_cat = [W_ih^T ; W_hh^T] with each gate's H columns padded to 128 lanes,
    shape (in_p + Hp, 4*Hp); bias = b_ih + b_hh padded per gate, shape (1, 4*Hp).
    """
    Ep = _round_up(emb_dim, LANE)
    Hp = _round_up(hid_dim, LANE)
    Vp = _round_up(output_dim, LANE)

    def pad_gate_cols(w_t, rows, rows_p):
        # w_t: (rows, 4*hid_dim), gate-major columns [i|f|g|o].
        w = w_t.reshape(rows, 4, hid_dim)
        w = jnp.pad(w, ((0, rows_p - rows), (0, 0), (0, Hp - hid_dim)))
        return w.reshape(rows_p, 4 * Hp)

    packed = {"embedding": jnp.pad(raw["embedding"], ((0, 0), (0, Ep - emb_dim)))}
    layers = []
    for layer in range(n_layers):
        p = raw["lstm"][layer]
        in_dim = emb_dim if layer == 0 else hid_dim
        in_p = Ep if layer == 0 else Hp
        w_cat = jnp.concatenate(
            [pad_gate_cols(p["w_ih"].T, in_dim, in_p),
             pad_gate_cols(p["w_hh"].T, hid_dim, Hp)], axis=0)
        b = (p["b_ih"] + p["b_hh"]).reshape(4, hid_dim)
        b = jnp.pad(b, ((0, 0), (0, Hp - hid_dim))).reshape(1, 4 * Hp)
        layers.append((w_cat, b))
    packed["lstm"] = layers
    packed["fc_w_t"] = jnp.pad(raw["fc_w"].T, ((0, Hp - hid_dim), (0, Vp - output_dim)))
    packed["fc_b"] = jnp.pad(raw["fc_b"].reshape(1, output_dim), ((0, 0), (0, Vp - output_dim)))
    return packed


# -------------------------------- forward pass ------------------------------ #

@functools.partial(jax.jit, static_argnames=("output_dim",))
def decoder_forward(packed, input_ids, hidden, cell, *, output_dim):
    """Mirror of Decoder.forward (eval mode).

    input_ids: (B, 1) int32; hidden/cell: (n_layers, B, H)
    returns prediction (B, V), hidden (n_layers, B, H), cell (n_layers, B, H)
    """
    n_layers, B, H = hidden.shape
    Ep = packed["embedding"].shape[-1]
    Hp = packed["lstm"][0][0].shape[-1] // 4
    Vp = packed["fc_w_t"].shape[-1]

    ids = input_ids.reshape(B).astype(jnp.int32)                 # seq_len == 1
    h_p = jnp.pad(hidden, ((0, 0), (0, 0), (0, Hp - H)))
    c_p = jnp.pad(cell, ((0, 0), (0, 0), (0, Hp - H)))

    args = [ids, packed["embedding"], h_p, c_p]
    in_specs = [
        pl.BlockSpec(memory_space=pltpu.MemorySpace.SMEM),        # token ids
        pl.BlockSpec(memory_space=pl.ANY),                        # embedding stays in HBM
        _vmem(), _vmem(),                                         # hidden, cell
    ]
    for w_cat, b in packed["lstm"]:
        args += [w_cat, b]
        in_specs += [_vmem(), _vmem()]
    args += [packed["fc_w_t"], packed["fc_b"]]
    in_specs += [_vmem(), _vmem()]

    pred_p, h_out_p, c_out_p = pl.pallas_call(
        _make_decoder_kernel(n_layers),
        out_shape=(
            jax.ShapeDtypeStruct((B, Vp), jnp.float32),
            jax.ShapeDtypeStruct((n_layers, B, Hp), jnp.float32),
            jax.ShapeDtypeStruct((n_layers, B, Hp), jnp.float32),
        ),
        in_specs=in_specs,
        out_specs=(_vmem(), _vmem(), _vmem()),
        scratch_shapes=[
            pltpu.VMEM((B, Ep), jnp.float32),                     # gathered embedding rows
            pltpu.SemaphoreType.DMA((B,)),
        ],
        # In-place state update: hidden -> new hidden, cell -> new cell.
        input_output_aliases={2: 1, 3: 2},
    )(*args)

    return pred_p[:, :output_dim], h_out_p[..., :H], c_out_p[..., :H]


# --------------------------- pure-JAX reference check ------------------------ #

def decoder_forward_ref(raw, input_ids, hidden, cell):
    H = hidden.shape[-1]
    x = raw["embedding"][input_ids[:, 0]]
    new_h, new_c = [], []
    for layer, p in enumerate(raw["lstm"]):
        gates = x @ p["w_ih"].T + hidden[layer] @ p["w_hh"].T + p["b_ih"] + p["b_hh"]
        i = jax.nn.sigmoid(gates[:, 0 * H:1 * H])
        f = jax.nn.sigmoid(gates[:, 1 * H:2 * H])
        g = jnp.tanh(gates[:, 2 * H:3 * H])
        o = jax.nn.sigmoid(gates[:, 3 * H:4 * H])
        c_new = f * cell[layer] + i * g
        h_new = o * jnp.tanh(c_new)
        new_h.append(h_new)
        new_c.append(c_new)
        x = h_new
    pred = x @ raw["fc_w"].T + raw["fc_b"]
    return pred, jnp.stack(new_h), jnp.stack(new_c)


# ------------------------------------ main ----------------------------------- #

if __name__ == "__main__":
    # Small shapes consistent with the module (emb/hid kept modest but TPU-friendly;
    # vocab & emb deliberately non-multiples of 128 to exercise the padding path).
    OUTPUT_DIM = 200   # vocab size
    EMB_DIM = 96
    HID_DIM = 128
    N_LAYERS = 2
    BATCH = 8

    key = jax.random.PRNGKey(0)
    k_params, k_ids, k_h, k_c = jax.random.split(key, 4)

    raw_params = init_decoder_params(k_params, OUTPUT_DIM, EMB_DIM, HID_DIM, N_LAYERS)
    packed_params = pack_decoder_params(raw_params, OUTPUT_DIM, EMB_DIM, HID_DIM, N_LAYERS)

    input_ids = jax.random.randint(k_ids, (BATCH, 1), 0, OUTPUT_DIM, jnp.int32)
    hidden = jax.random.normal(k_h, (N_LAYERS, BATCH, HID_DIM), jnp.float32)
    cell = jax.random.normal(k_c, (N_LAYERS, BATCH, HID_DIM), jnp.float32)

    pred, new_h, new_c = decoder_forward(packed_params, input_ids, hidden, cell,
                                         output_dim=OUTPUT_DIM)
    jax.block_until_ready((pred, new_h, new_c))

    # Sanity check against a pure-JAX reference in PyTorch layout.
    pred_r, h_r, c_r = decoder_forward_ref(raw_params, input_ids, hidden, cell)
    assert pred.shape == (BATCH, OUTPUT_DIM)
    assert new_h.shape == (N_LAYERS, BATCH, HID_DIM)
    assert new_c.shape == (N_LAYERS, BATCH, HID_DIM)
    # Tolerance accounts for the different matmul split (fused [x|h] @ W vs two dots)
    # and MXU vs XLA accumulation order.
    assert jnp.allclose(pred, pred_r, atol=1e-4, rtol=1e-4)
    assert jnp.allclose(new_h, h_r, atol=1e-4, rtol=1e-4)
    assert jnp.allclose(new_c, c_r, atol=1e-4, rtol=1e-4)

    print("KERNEL_OK")
</pallas_src>

<mosaic_0001>
module attributes {stable_mosaic.version = 11 : i64} {
  func.func @kernel(%arg0: memref<8xi32, #tpu.memory_space<smem>>, %arg1: memref<200x128xf32, #tpu.memory_space<any>>, %arg2: memref<2x8x128xf32, #tpu.memory_space<vmem>>, %arg3: memref<2x8x128xf32, #tpu.memory_space<vmem>>, %arg4: memref<256x512xf32, #tpu.memory_space<vmem>>, %arg5: memref<1x512xf32, #tpu.memory_space<vmem>>, %arg6: memref<256x512xf32, #tpu.memory_space<vmem>>, %arg7: memref<1x512xf32, #tpu.memory_space<vmem>>, %arg8: memref<128x256xf32, #tpu.memory_space<vmem>>, %arg9: memref<1x256xf32, #tpu.memory_space<vmem>>, %arg10: memref<8x256xf32, #tpu.memory_space<vmem>>, %arg11: memref<2x8x128xf32, #tpu.memory_space<vmem>>, %arg12: memref<2x8x128xf32, #tpu.memory_space<vmem>>, %arg13: memref<8x128xf32, #tpu.memory_space<vmem>>, %arg14: memref<8x!tpu.dma_semaphore, #tpu.memory_space<semaphore_mem>>) attributes {dimension_semantics = [], scalar_prefetch = 0 : i64, scratch_operands = 2 : i64, tpu.core_type = #tpu.core_type<tc>} {
    %c0 = arith.constant 0 : index
    %0 = memref.load %arg0[%c0] : memref<8xi32, #tpu.memory_space<smem>>
    %c0_i32 = arith.constant 0 : i32
    %c0_i32_0 = arith.constant 0 : i32
    %1 = tpu.memref_slice %arg1[%0, %c0_i32_0] : memref<200x128xf32, #tpu.memory_space<any>> -> memref<1x128xf32, #tpu.memory_space<any>>
    %c0_i32_1 = arith.constant 0 : i32
    %c0_i32_2 = arith.constant 0 : i32
    %2 = tpu.memref_slice %arg13[%c0_i32_1, %c0_i32_2] : memref<8x128xf32, #tpu.memory_space<vmem>> -> memref<1x128xf32, #tpu.memory_space<vmem>>
    %3 = tpu.memref_slice %arg14[%c0_i32] : memref<8x!tpu.dma_semaphore, #tpu.memory_space<semaphore_mem>> -> memref<1x!tpu.dma_semaphore, #tpu.memory_space<semaphore_mem>>
    %4 = tpu.memref_squeeze %3 : memref<1x!tpu.dma_semaphore, #tpu.memory_space<semaphore_mem>> -> memref<!tpu.dma_semaphore, #tpu.memory_space<semaphore_mem>>
    tpu.enqueue_dma source(%1 : memref<1x128xf32, #tpu.memory_space<any>>) target(%2 : memref<1x128xf32, #tpu.memory_space<vmem>>) target_semaphore(%4 : memref<!tpu.dma_semaphore, #tpu.memory_space<semaphore_mem>>)
    %c1 = arith.constant 1 : index
    %5 = memref.load %arg0[%c1] : memref<8xi32, #tpu.memory_space<smem>>
    %c1_i32 = arith.constant 1 : i32
    %c0_i32_3 = arith.constant 0 : i32
    %6 = tpu.memref_slice %arg1[%5, %c0_i32_3] : memref<200x128xf32, #tpu.memory_space<any>> -> memref<1x128xf32, #tpu.memory_space<any>>
    %c1_i32_4 = arith.constant 1 : i32
    %c0_i32_5 = arith.constant 0 : i32
    %7 = tpu.memref_slice %arg13[%c1_i32_4, %c0_i32_5] : memref<8x128xf32, #tpu.memory_space<vmem>> -> memref<1x128xf32, #tpu.memory_space<vmem>>
    %8 = tpu.memref_slice %arg14[%c1_i32] : memref<8x!tpu.dma_semaphore, #tpu.memory_space<semaphore_mem>> -> memref<1x!tpu.dma_semaphore, #tpu.memory_space<semaphore_mem>>
    %9 = tpu.memref_squeeze %8 : memref<1x!tpu.dma_semaphore, #tpu.memory_space<semaphore_mem>> -> memref<!tpu.dma_semaphore, #tpu.memory_space<semaphore_mem>>
    tpu.enqueue_dma source(%6 : memref<1x128xf32, #tpu.memory_space<any>>) target(%7 : memref<1x128xf32, #tpu.memory_space<vmem>>) target_semaphore(%9 : memref<!tpu.dma_semaphore, #tpu.memory_space<semaphore_mem>>)
    %c2 = arith.constant 2 : index
    %10 = memref.load %arg0[%c2] : memref<8xi32, #tpu.memory_space<smem>>
    %c2_i32 = arith.constant 2 : i32
    %c0_i32_6 = arith.constant 0 : i32
    %11 = tpu.memref_slice %arg1[%10, %c0_i32_6] : memref<200x128xf32, #tpu.memory_space<any>> -> memref<1x128xf32, #tpu.memory_space<any>>
    %c2_i32_7 = arith.constant 2 : i32
    %c0_i32_8 = arith.constant 0 : i32
    %12 = tpu.memref_slice %arg13[%c2_i32_7, %c0_i32_8] : memref<8x128xf32, #tpu.memory_space<vmem>> -> memref<1x128xf32, #tpu.memory_space<vmem>>
    %13 = tpu.memref_slice %arg14[%c2_i32] : memref<8x!tpu.dma_semaphore, #tpu.memory_space<semaphore_mem>> -> memref<1x!tpu.dma_semaphore, #tpu.memory_space<semaphore_mem>>
    %14 = tpu.memref_squeeze %13 : memref<1x!tpu.dma_semaphore, #tpu.memory_space<semaphore_mem>> -> memref<!tpu.dma_semaphore, #tpu.memory_space<semaphore_mem>>
    tpu.enqueue_dma source(%11 : memref<1x128xf32, #tpu.memory_space<any>>) target(%12 : memref<1x128xf32, #tpu.memory_space<vmem>>) target_semaphore(%14 : memref<!tpu.dma_semaphore, #tpu.memory_space<semaphore_mem>>)
    %c3 = arith.constant 3 : index
    %15 = memref.load %arg0[%c3] : memref<8xi32, #tpu.memory_space<smem>>
    %c3_i32 = arith.constant 3 : i32
    %c0_i32_9 = arith.constant 0 : i32
    %16 = tpu.memref_slice %arg1[%15, %c0_i32_9] : memref<200x128xf32, #tpu.memory_space<any>> -> memref<1x128xf32, #tpu.memory_space<any>>
    %c3_i32_10 = arith.constant 3 : i32
    %c0_i32_11 = arith.constant 0 : i32
    %17 = tpu.memref_slice %arg13[%c3_i32_10, %c0_i32_11] : memref<8x128xf32, #tpu.memory_space<vmem>> -> memref<1x128xf32, #tpu.memory_space<vmem>>
    %18 = tpu.memref_slice %arg14[%c3_i32] : memref<8x!tpu.dma_semaphore, #tpu.memory_space<semaphore_mem>> -> memref<1x!tpu.dma_semaphore, #tpu.memory_space<semaphore_mem>>
    %19 = tpu.memref_squeeze %18 : memref<1x!tpu.dma_semaphore, #tpu.memory_space<semaphore_mem>> -> memref<!tpu.dma_semaphore, #tpu.memory_space<semaphore_mem>>
    tpu.enqueue_dma source(%16 : memref<1x128xf32, #tpu.memory_space<any>>) target(%17 : memref<1x128xf32, #tpu.memory_space<vmem>>) target_semaphore(%19 : memref<!tpu.dma_semaphore, #tpu.memory_space<semaphore_mem>>)
    %c4 = arith.constant 4 : index
    %20 = memref.load %arg0[%c4] : memref<8xi32, #tpu.memory_space<smem>>
    %c4_i32 = arith.constant 4 : i32
    %c0_i32_12 = arith.constant 0 : i32
    %21 = tpu.memref_slice %arg1[%20, %c0_i32_12] : memref<200x128xf32, #tpu.memory_space<any>> -> memref<1x128xf32, #tpu.memory_space<any>>
    %c4_i32_13 = arith.constant 4 : i32
    %c0_i32_14 = arith.constant 0 : i32
    %22 = tpu.memref_slice %arg13[%c4_i32_13, %c0_i32_14] : memref<8x128xf32, #tpu.memory_space<vmem>> -> memref<1x128xf32, #tpu.memory_space<vmem>>
    %23 = tpu.memref_slice %arg14[%c4_i32] : memref<8x!tpu.dma_semaphore, #tpu.memory_space<semaphore_mem>> -> memref<1x!tpu.dma_semaphore, #tpu.memory_space<semaphore_mem>>
    %24 = tpu.memref_squeeze %23 : memref<1x!tpu.dma_semaphore, #tpu.memory_space<semaphore_mem>> -> memref<!tpu.dma_semaphore, #tpu.memory_space<semaphore_mem>>
    tpu.enqueue_dma source(%21 : memref<1x128xf32, #tpu.memory_space<any>>) target(%22 : memref<1x128xf32, #tpu.memory_space<vmem>>) target_semaphore(%24 : memref<!tpu.dma_semaphore, #tpu.memory_space<semaphore_mem>>)
    %c5 = arith.constant 5 : index
    %25 = memref.load %arg0[%c5] : memref<8xi32, #tpu.memory_space<smem>>
    %c5_i32 = arith.constant 5 : i32
    %c0_i32_15 = arith.constant 0 : i32
    %26 = tpu.memref_slice %arg1[%25, %c0_i32_15] : memref<200x128xf32, #tpu.memory_space<any>> -> memref<1x128xf32, #tpu.memory_space<any>>
    %c5_i32_16 = arith.constant 5 : i32
    %c0_i32_17 = arith.constant 0 : i32
    %27 = tpu.memref_slice %arg13[%c5_i32_16, %c0_i32_17] : memref<8x128xf32, #tpu.memory_space<vmem>> -> memref<1x128xf32, #tpu.memory_space<vmem>>
    %28 = tpu.memref_slice %arg14[%c5_i32] : memref<8x!tpu.dma_semaphore, #tpu.memory_space<semaphore_mem>> -> memref<1x!tpu.dma_semaphore, #tpu.memory_space<semaphore_mem>>
    %29 = tpu.memref_squeeze %28 : memref<1x!tpu.dma_semaphore, #tpu.memory_space<semaphore_mem>> -> memref<!tpu.dma_semaphore, #tpu.memory_space<semaphore_mem>>
    tpu.enqueue_dma source(%26 : memref<1x128xf32, #tpu.memory_space<any>>) target(%27 : memref<1x128xf32, #tpu.memory_space<vmem>>) target_semaphore(%29 : memref<!tpu.dma_semaphore, #tpu.memory_space<semaphore_mem>>)
    %c6 = arith.constant 6 : index
    %30 = memref.load %arg0[%c6] : memref<8xi32, #tpu.memory_space<smem>>
    %c6_i32 = arith.constant 6 : i32
    %c0_i32_18 = arith.constant 0 : i32
    %31 = tpu.memref_slice %arg1[%30, %c0_i32_18] : memref<200x128xf32, #tpu.memory_space<any>> -> memref<1x128xf32, #tpu.memory_space<any>>
    %c6_i32_19 = arith.constant 6 : i32
    %c0_i32_20 = arith.constant 0 : i32
    %32 = tpu.memref_slice %arg13[%c6_i32_19, %c0_i32_20] : memref<8x128xf32, #tpu.memory_space<vmem>> -> memref<1x128xf32, #tpu.memory_space<vmem>>
    %33 = tpu.memref_slice %arg14[%c6_i32] : memref<8x!tpu.dma_semaphore, #tpu.memory_space<semaphore_mem>> -> memref<1x!tpu.dma_semaphore, #tpu.memory_space<semaphore_mem>>
    %34 = tpu.memref_squeeze %33 : memref<1x!tpu.dma_semaphore, #tpu.memory_space<semaphore_mem>> -> memref<!tpu.dma_semaphore, #tpu.memory_space<semaphore_mem>>
    tpu.enqueue_dma source(%31 : memref<1x128xf32, #tpu.memory_space<any>>) target(%32 : memref<1x128xf32, #tpu.memory_space<vmem>>) target_semaphore(%34 : memref<!tpu.dma_semaphore, #tpu.memory_space<semaphore_mem>>)
    %c7 = arith.constant 7 : index
    %35 = memref.load %arg0[%c7] : memref<8xi32, #tpu.memory_space<smem>>
    %c7_i32 = arith.constant 7 : i32
    %c0_i32_21 = arith.constant 0 : i32
    %36 = tpu.memref_slice %arg1[%35, %c0_i32_21] : memref<200x128xf32, #tpu.memory_space<any>> -> memref<1x128xf32, #tpu.memory_space<any>>
    %c7_i32_22 = arith.constant 7 : i32
    %c0_i32_23 = arith.constant 0 : i32
    %37 = tpu.memref_slice %arg13[%c7_i32_22, %c0_i32_23] : memref<8x128xf32, #tpu.memory_space<vmem>> -> memref<1x128xf32, #tpu.memory_space<vmem>>
    %38 = tpu.memref_slice %arg14[%c7_i32] : memref<8x!tpu.dma_semaphore, #tpu.memory_space<semaphore_mem>> -> memref<1x!tpu.dma_semaphore, #tpu.memory_space<semaphore_mem>>
    %39 = tpu.memref_squeeze %38 : memref<1x!tpu.dma_semaphore, #tpu.memory_space<semaphore_mem>> -> memref<!tpu.dma_semaphore, #tpu.memory_space<semaphore_mem>>
    tpu.enqueue_dma source(%36 : memref<1x128xf32, #tpu.memory_space<any>>) target(%37 : memref<1x128xf32, #tpu.memory_space<vmem>>) target_semaphore(%39 : memref<!tpu.dma_semaphore, #tpu.memory_space<semaphore_mem>>)
    %c0_24 = arith.constant 0 : index
    %40 = memref.load %arg0[%c0_24] : memref<8xi32, #tpu.memory_space<smem>>
    %c0_i32_25 = arith.constant 0 : i32
    %c0_i32_26 = arith.constant 0 : i32
    %41 = tpu.memref_slice %arg1[%40, %c0_i32_26] : memref<200x128xf32, #tpu.memory_space<any>> -> memref<1x128xf32, #tpu.memory_space<any>>
    %c0_i32_27 = arith.constant 0 : i32
    %c0_i32_28 = arith.constant 0 : i32
    %42 = tpu.memref_slice %arg13[%c0_i32_27, %c0_i32_28] : memref<8x128xf32, #tpu.memory_space<vmem>> -> memref<1x128xf32, #tpu.memory_space<vmem>>
    %43 = tpu.memref_slice %arg14[%c0_i32_25] : memref<8x!tpu.dma_semaphore, #tpu.memory_space<semaphore_mem>> -> memref<1x!tpu.dma_semaphore, #tpu.memory_space<semaphore_mem>>
    %44 = tpu.memref_squeeze %43 : memref<1x!tpu.dma_semaphore, #tpu.memory_space<semaphore_mem>> -> memref<!tpu.dma_semaphore, #tpu.memory_space<semaphore_mem>>
    tpu.wait_dma2 semaphore(%44 : memref<!tpu.dma_semaphore, #tpu.memory_space<semaphore_mem>>) src(%41 : memref<1x128xf32, #tpu.memory_space<any>>) dst(%42 : memref<1x128xf32, #tpu.memory_space<vmem>>)
    %c1_29 = arith.constant 1 : index
    %45 = memref.load %arg0[%c1_29] : memref<8xi32, #tpu.memory_space<smem>>
    %c1_i32_30 = arith.constant 1 : i32
    %c0_i32_31 = arith.constant 0 : i32
    %46 = tpu.memref_slice %arg1[%45, %c0_i32_31] : memref<200x128xf32, #tpu.memory_space<any>> -> memref<1x128xf32, #tpu.memory_space<any>>
    %c1_i32_32 = arith.constant 1 : i32
    %c0_i32_33 = arith.constant 0 : i32
    %47 = tpu.memref_slice %arg13[%c1_i32_32, %c0_i32_33] : memref<8x128xf32, #tpu.memory_space<vmem>> -> memref<1x128xf32, #tpu.memory_space<vmem>>
    %48 = tpu.memref_slice %arg14[%c1_i32_30] : memref<8x!tpu.dma_semaphore, #tpu.memory_space<semaphore_mem>> -> memref<1x!tpu.dma_semaphore, #tpu.memory_space<semaphore_mem>>
    %49 = tpu.memref_squeeze %48 : memref<1x!tpu.dma_semaphore, #tpu.memory_space<semaphore_mem>> -> memref<!tpu.dma_semaphore, #tpu.memory_space<semaphore_mem>>
    tpu.wait_dma2 semaphore(%49 : memref<!tpu.dma_semaphore, #tpu.memory_space<semaphore_mem>>) src(%46 : memref<1x128xf32, #tpu.memory_space<any>>) dst(%47 : memref<1x128xf32, #tpu.memory_space<vmem>>)
    %c2_34 = arith.constant 2 : index
    %50 = memref.load %arg0[%c2_34] : memref<8xi32, #tpu.memory_space<smem>>
    %c2_i32_35 = arith.constant 2 : i32
    %c0_i32_36 = arith.constant 0 : i32
    %51 = tpu.memref_slice %arg1[%50, %c0_i32_36] : memref<200x128xf32, #tpu.memory_space<any>> -> memref<1x128xf32, #tpu.memory_space<any>>
    %c2_i32_37 = arith.constant 2 : i32
    %c0_i32_38 = arith.constant 0 : i32
    %52 = tpu.memref_slice %arg13[%c2_i32_37, %c0_i32_38] : memref<8x128xf32, #tpu.memory_space<vmem>> -> memref<1x128xf32, #tpu.memory_space<vmem>>
    %53 = tpu.memref_slice %arg14[%c2_i32_35] : memref<8x!tpu.dma_semaphore, #tpu.memory_space<semaphore_mem>> -> memref<1x!tpu.dma_semaphore, #tpu.memory_space<semaphore_mem>>
    %54 = tpu.memref_squeeze %53 : memref<1x!tpu.dma_semaphore, #tpu.memory_space<semaphore_mem>> -> memref<!tpu.dma_semaphore, #tpu.memory_space<semaphore_mem>>
    tpu.wait_dma2 semaphore(%54 : memref<!tpu.dma_semaphore, #tpu.memory_space<semaphore_mem>>) src(%51 : memref<1x128xf32, #tpu.memory_space<any>>) dst(%52 : memref<1x128xf32, #tpu.memory_space<vmem>>)
    %c3_39 = arith.constant 3 : index
    %55 = memref.load %arg0[%c3_39] : memref<8xi32, #tpu.memory_space<smem>>
    %c3_i32_40 = arith.constant 3 : i32
    %c0_i32_41 = arith.constant 0 : i32
    %56 = tpu.memref_slice %arg1[%55, %c0_i32_41] : memref<200x128xf32, #tpu.memory_space<any>> -> memref<1x128xf32, #tpu.memory_space<any>>
    %c3_i32_42 = arith.constant 3 : i32
    %c0_i32_43 = arith.constant 0 : i32
    %57 = tpu.memref_slice %arg13[%c3_i32_42, %c0_i32_43] : memref<8x128xf32, #tpu.memory_space<vmem>> -> memref<1x128xf32, #tpu.memory_space<vmem>>
    %58 = tpu.memref_slice %arg14[%c3_i32_40] : memref<8x!tpu.dma_semaphore, #tpu.memory_space<semaphore_mem>> -> memref<1x!tpu.dma_semaphore, #tpu.memory_space<semaphore_mem>>
    %59 = tpu.memref_squeeze %58 : memref<1x!tpu.dma_semaphore, #tpu.memory_space<semaphore_mem>> -> memref<!tpu.dma_semaphore, #tpu.memory_space<semaphore_mem>>
    tpu.wait_dma2 semaphore(%59 : memref<!tpu.dma_semaphore, #tpu.memory_space<semaphore_mem>>) src(%56 : memref<1x128xf32, #tpu.memory_space<any>>) dst(%57 : memref<1x128xf32, #tpu.memory_space<vmem>>)
    %c4_44 = arith.constant 4 : index
    %60 = memref.load %arg0[%c4_44] : memref<8xi32, #tpu.memory_space<smem>>
    %c4_i32_45 = arith.constant 4 : i32
    %c0_i32_46 = arith.constant 0 : i32
    %61 = tpu.memref_slice %arg1[%60, %c0_i32_46] : memref<200x128xf32, #tpu.memory_space<any>> -> memref<1x128xf32, #tpu.memory_space<any>>
    %c4_i32_47 = arith.constant 4 : i32
    %c0_i32_48 = arith.constant 0 : i32
    %62 = tpu.memref_slice %arg13[%c4_i32_47, %c0_i32_48] : memref<8x128xf32, #tpu.memory_space<vmem>> -> memref<1x128xf32, #tpu.memory_space<vmem>>
    %63 = tpu.memref_slice %arg14[%c4_i32_45] : memref<8x!tpu.dma_semaphore, #tpu.memory_space<semaphore_mem>> -> memref<1x!tpu.dma_semaphore, #tpu.memory_space<semaphore_mem>>
    %64 = tpu.memref_squeeze %63 : memref<1x!tpu.dma_semaphore, #tpu.memory_space<semaphore_mem>> -> memref<!tpu.dma_semaphore, #tpu.memory_space<semaphore_mem>>
    tpu.wait_dma2 semaphore(%64 : memref<!tpu.dma_semaphore, #tpu.memory_space<semaphore_mem>>) src(%61 : memref<1x128xf32, #tpu.memory_space<any>>) dst(%62 : memref<1x128xf32, #tpu.memory_space<vmem>>)
    %c5_49 = arith.constant 5 : index
    %65 = memref.load %arg0[%c5_49] : memref<8xi32, #tpu.memory_space<smem>>
    %c5_i32_50 = arith.constant 5 : i32
    %c0_i32_51 = arith.constant 0 : i32
    %66 = tpu.memref_slice %arg1[%65, %c0_i32_51] : memref<200x128xf32, #tpu.memory_space<any>> -> memref<1x128xf32, #tpu.memory_space<any>>
    %c5_i32_52 = arith.constant 5 : i32
    %c0_i32_53 = arith.constant 0 : i32
    %67 = tpu.memref_slice %arg13[%c5_i32_52, %c0_i32_53] : memref<8x128xf32, #tpu.memory_space<vmem>> -> memref<1x128xf32, #tpu.memory_space<vmem>>
    %68 = tpu.memref_slice %arg14[%c5_i32_50] : memref<8x!tpu.dma_semaphore, #tpu.memory_space<semaphore_mem>> -> memref<1x!tpu.dma_semaphore, #tpu.memory_space<semaphore_mem>>
    %69 = tpu.memref_squeeze %68 : memref<1x!tpu.dma_semaphore, #tpu.memory_space<semaphore_mem>> -> memref<!tpu.dma_semaphore, #tpu.memory_space<semaphore_mem>>
    tpu.wait_dma2 semaphore(%69 : memref<!tpu.dma_semaphore, #tpu.memory_space<semaphore_mem>>) src(%66 : memref<1x128xf32, #tpu.memory_space<any>>) dst(%67 : memref<1x128xf32, #tpu.memory_space<vmem>>)
    %c6_54 = arith.constant 6 : index
    %70 = memref.load %arg0[%c6_54] : memref<8xi32, #tpu.memory_space<smem>>
    %c6_i32_55 = arith.constant 6 : i32
    %c0_i32_56 = arith.constant 0 : i32
    %71 = tpu.memref_slice %arg1[%70, %c0_i32_56] : memref<200x128xf32, #tpu.memory_space<any>> -> memref<1x128xf32, #tpu.memory_space<any>>
    %c6_i32_57 = arith.constant 6 : i32
    %c0_i32_58 = arith.constant 0 : i32
    %72 = tpu.memref_slice %arg13[%c6_i32_57, %c0_i32_58] : memref<8x128xf32, #tpu.memory_space<vmem>> -> memref<1x128xf32, #tpu.memory_space<vmem>>
    %73 = tpu.memref_slice %arg14[%c6_i32_55] : memref<8x!tpu.dma_semaphore, #tpu.memory_space<semaphore_mem>> -> memref<1x!tpu.dma_semaphore, #tpu.memory_space<semaphore_mem>>
    %74 = tpu.memref_squeeze %73 : memref<1x!tpu.dma_semaphore, #tpu.memory_space<semaphore_mem>> -> memref<!tpu.dma_semaphore, #tpu.memory_space<semaphore_mem>>
    tpu.wait_dma2 semaphore(%74 : memref<!tpu.dma_semaphore, #tpu.memory_space<semaphore_mem>>) src(%71 : memref<1x128xf32, #tpu.memory_space<any>>) dst(%72 : memref<1x128xf32, #tpu.memory_space<vmem>>)
    %c7_59 = arith.constant 7 : index
    %75 = memref.load %arg0[%c7_59] : memref<8xi32, #tpu.memory_space<smem>>
    %c7_i32_60 = arith.constant 7 : i32
    %c0_i32_61 = arith.constant 0 : i32
    %76 = tpu.memref_slice %arg1[%75, %c0_i32_61] : memref<200x128xf32, #tpu.memory_space<any>> -> memref<1x128xf32, #tpu.memory_space<any>>
    %c7_i32_62 = arith.constant 7 : i32
    %c0_i32_63 = arith.constant 0 : i32
    %77 = tpu.memref_slice %arg13[%c7_i32_62, %c0_i32_63] : memref<8x128xf32, #tpu.memory_space<vmem>> -> memref<1x128xf32, #tpu.memory_space<vmem>>
    %78 = tpu.memref_slice %arg14[%c7_i32_60] : memref<8x!tpu.dma_semaphore, #tpu.memory_space<semaphore_mem>> -> memref<1x!tpu.dma_semaphore, #tpu.memory_space<semaphore_mem>>
    %79 = tpu.memref_squeeze %78 : memref<1x!tpu.dma_semaphore, #tpu.memory_space<semaphore_mem>> -> memref<!tpu.dma_semaphore, #tpu.memory_space<semaphore_mem>>
    tpu.wait_dma2 semaphore(%79 : memref<!tpu.dma_semaphore, #tpu.memory_space<semaphore_mem>>) src(%76 : memref<1x128xf32, #tpu.memory_space<any>>) dst(%77 : memref<1x128xf32, #tpu.memory_space<vmem>>)
    %c0_64 = arith.constant 0 : index
    %c0_65 = arith.constant 0 : index
    %80 = vector.load %arg13[%c0_64, %c0_65] : memref<8x128xf32, #tpu.memory_space<vmem>>, vector<8x128xf32>
    %c0_66 = arith.constant 0 : index
    %c0_67 = arith.constant 0 : index
    %c0_68 = arith.constant 0 : index
    %81 = vector.load %arg2[%c0_66, %c0_67, %c0_68] : memref<2x8x128xf32, #tpu.memory_space<vmem>>, vector<1x8x128xf32>
    %82 = vector.shape_cast %81 : vector<1x8x128xf32> to vector<8x128xf32>
    %c0_69 = arith.constant 0 : index
    %c0_70 = arith.constant 0 : index
    %c0_71 = arith.constant 0 : index
    %83 = vector.load %arg3[%c0_69, %c0_70, %c0_71] : memref<2x8x128xf32, #tpu.memory_space<vmem>>, vector<1x8x128xf32>
    %84 = vector.shape_cast %83 : vector<1x8x128xf32> to vector<8x128xf32>
    %85 = tpu.concatenate %80, %82 in 1 : vector<8x128xf32>, vector<8x128xf32> -> vector<8x256xf32>
    %c0_72 = arith.constant 0 : index
    %c0_73 = arith.constant 0 : index
    %86 = vector.load %arg4[%c0_72, %c0_73] : memref<256x512xf32, #tpu.memory_space<vmem>>, vector<256x512xf32>
    %cst = arith.constant dense<0.000000e+00> : vector<8x512xf32>
    %87 = tpu.matmul %85, %86, %cst {dimension_numbers = #tpu.dot_dimension_numbers<[1], [0], [0], [1], [0, 0, 1, 1], [], []>} : vector<8x256xf32>, vector<256x512xf32>, vector<8x512xf32> -> vector<8x512xf32>
    %c0_74 = arith.constant 0 : index
    %c0_75 = arith.constant 0 : index
    %88 = vector.load %arg5[%c0_74, %c0_75] : memref<1x512xf32, #tpu.memory_space<vmem>>, vector<1x512xf32>
    %89 = vector.broadcast %88 : vector<1x512xf32> to vector<8x512xf32>
    %90 = arith.addf %87, %89 : vector<8x512xf32>
    %91 = vector.extract_strided_slice %90 {offsets = [0, 0], sizes = [8, 128], strides = [1, 1]} : vector<8x512xf32> to vector<8x128xf32>
    %92 = arith.negf %91 : vector<8x128xf32>
    %93 = math.exp %92 : vector<8x128xf32>
    %cst_76 = arith.constant 1.000000e+00 : f32
    %94 = vector.broadcast %cst_76 : f32 to vector<8x128xf32>
    %95 = arith.addf %94, %93 : vector<8x128xf32>
    %96 = arith.divf %94, %95 : vector<8x128xf32>
    %97 = vector.extract_strided_slice %90 {offsets = [0, 128], sizes = [8, 128], strides = [1, 1]} : vector<8x512xf32> to vector<8x128xf32>
    %98 = arith.negf %97 : vector<8x128xf32>
    %99 = math.exp %98 : vector<8x128xf32>
    %cst_77 = arith.constant 1.000000e+00 : f32
    %100 = vector.broadcast %cst_77 : f32 to vector<8x128xf32>
    %101 = arith.addf %100, %99 : vector<8x128xf32>
    %102 = arith.divf %100, %101 : vector<8x128xf32>
    %103 = vector.extract_strided_slice %90 {offsets = [0, 256], sizes = [8, 128], strides = [1, 1]} : vector<8x512xf32> to vector<8x128xf32>
    %104 = math.tanh %103 : vector<8x128xf32>
    %105 = vector.extract_strided_slice %90 {offsets = [0, 384], sizes = [8, 128], strides = [1, 1]} : vector<8x512xf32> to vector<8x128xf32>
    %106 = arith.negf %105 : vector<8x128xf32>
    %107 = math.exp %106 : vector<8x128xf32>
    %cst_78 = arith.constant 1.000000e+00 : f32
    %108 = vector.broadcast %cst_78 : f32 to vector<8x128xf32>
    %109 = arith.addf %108, %107 : vector<8x128xf32>
    %110 = arith.divf %108, %109 : vector<8x128xf32>
    %111 = arith.mulf %102, %84 : vector<8x128xf32>
    %112 = arith.mulf %96, %104 : vector<8x128xf32>
    %113 = arith.addf %111, %112 : vector<8x128xf32>
    %114 = math.tanh %113 : vector<8x128xf32>
    %115 = arith.mulf %110, %114 : vector<8x128xf32>
    %c0_79 = arith.constant 0 : index
    %c0_80 = arith.constant 0 : index
    %c0_81 = arith.constant 0 : index
    %116 = vector.load %arg11[%c0_79, %c0_80, %c0_81] : memref<2x8x128xf32, #tpu.memory_space<vmem>>, vector<1x8x128xf32>
    %117 = vector.shape_cast %116 : vector<1x8x128xf32> to vector<8x128xf32>
    %118 = vector.shape_cast %115 : vector<8x128xf32> to vector<1x8x128xf32>
    tpu.vector_store %arg11[%c0_79, %c0_80, %c0_81], %118 {strides = array<i32>} : memref<2x8x128xf32, #tpu.memory_space<vmem>>, vector<1x8x128xf32>,
    %c0_82 = arith.constant 0 : index
    %c0_83 = arith.constant 0 : index
    %c0_84 = arith.constant 0 : index
    %119 = vector.load %arg12[%c0_82, %c0_83, %c0_84] : memref<2x8x128xf32, #tpu.memory_space<vmem>>, vector<1x8x128xf32>
    %120 = vector.shape_cast %119 : vector<1x8x128xf32> to vector<8x128xf32>
    %121 = vector.shape_cast %113 : vector<8x128xf32> to vector<1x8x128xf32>
    tpu.vector_store %arg12[%c0_82, %c0_83, %c0_84], %121 {strides = array<i32>} : memref<2x8x128xf32, #tpu.memory_space<vmem>>, vector<1x8x128xf32>,
    %c1_85 = arith.constant 1 : index
    %c0_86 = arith.constant 0 : index
    %c0_87 = arith.constant 0 : index
    %122 = vector.load %arg2[%c1_85, %c0_86, %c0_87] : memref<2x8x128xf32, #tpu.memory_space<vmem>>, vector<1x8x128xf32>
    %123 = vector.shape_cast %122 : vector<1x8x128xf32> to vector<8x128xf32>
    %c1_88 = arith.constant 1 : index
    %c0_89 = arith.constant 0 : index
    %c0_90 = arith.constant 0 : index
    %124 = vector.load %arg3[%c1_88, %c0_89, %c0_90] : memref<2x8x128xf32, #tpu.memory_space<vmem>>, vector<1x8x128xf32>
    %125 = vector.shape_cast %124 : vector<1x8x128xf32> to vector<8x128xf32>
    %126 = tpu.concatenate %115, %123 in 1 : vector<8x128xf32>, vector<8x128xf32> -> vector<8x256xf32>
    %c0_91 = arith.constant 0 : index
    %c0_92 = arith.constant 0 : index
    %127 = vector.load %arg6[%c0_91, %c0_92] : memref<256x512xf32, #tpu.memory_space<vmem>>, vector<256x512xf32>
    %cst_93 = arith.constant dense<0.000000e+00> : vector<8x512xf32>
    %128 = tpu.matmul %126, %127, %cst_93 {dimension_numbers = #tpu.dot_dimension_numbers<[1], [0], [0], [1], [0, 0, 1, 1], [], []>} : vector<8x256xf32>, vector<256x512xf32>, vector<8x512xf32> -> vector<8x512xf32>
    %c0_94 = arith.constant 0 : index
    %c0_95 = arith.constant 0 : index
    %129 = vector.load %arg7[%c0_94, %c0_95] : memref<1x512xf32, #tpu.memory_space<vmem>>, vector<1x512xf32>
    %130 = vector.broadcast %129 : vector<1x512xf32> to vector<8x512xf32>
    %131 = arith.addf %128, %130 : vector<8x512xf32>
    %132 = vector.extract_strided_slice %131 {offsets = [0, 0], sizes = [8, 128], strides = [1, 1]} : vector<8x512xf32> to vector<8x128xf32>
    %133 = arith.negf %132 : vector<8x128xf32>
    %134 = math.exp %133 : vector<8x128xf32>
    %cst_96 = arith.constant 1.000000e+00 : f32
    %135 = vector.broadcast %cst_96 : f32 to vector<8x128xf32>
    %136 = arith.addf %135, %134 : vector<8x128xf32>
    %137 = arith.divf %135, %136 : vector<8x128xf32>
    %138 = vector.extract_strided_slice %131 {offsets = [0, 128], sizes = [8, 128], strides = [1, 1]} : vector<8x512xf32> to vector<8x128xf32>
    %139 = arith.negf %138 : vector<8x128xf32>
    %140 = math.exp %139 : vector<8x128xf32>
    %cst_97 = arith.constant 1.000000e+00 : f32
    %141 = vector.broadcast %cst_97 : f32 to vector<8x128xf32>
    %142 = arith.addf %141, %140 : vector<8x128xf32>
    %143 = arith.divf %141, %142 : vector<8x128xf32>
    %144 = vector.extract_strided_slice %131 {offsets = [0, 256], sizes = [8, 128], strides = [1, 1]} : vector<8x512xf32> to vector<8x128xf32>
    %145 = math.tanh %144 : vector<8x128xf32>
    %146 = vector.extract_strided_slice %131 {offsets = [0, 384], sizes = [8, 128], strides = [1, 1]} : vector<8x512xf32> to vector<8x128xf32>
    %147 = arith.negf %146 : vector<8x128xf32>
    %148 = math.exp %147 : vector<8x128xf32>
    %cst_98 = arith.constant 1.000000e+00 : f32
    %149 = vector.broadcast %cst_98 : f32 to vector<8x128xf32>
    %150 = arith.addf %149, %148 : vector<8x128xf32>
    %151 = arith.divf %149, %150 : vector<8x128xf32>
    %152 = arith.mulf %143, %125 : vector<8x128xf32>
    %153 = arith.mulf %137, %145 : vector<8x128xf32>
    %154 = arith.addf %152, %153 : vector<8x128xf32>
    %155 = math.tanh %154 : vector<8x128xf32>
    %156 = arith.mulf %151, %155 : vector<8x128xf32>
    %c1_99 = arith.constant 1 : index
    %c0_100 = arith.constant 0 : index
    %c0_101 = arith.constant 0 : index
    %157 = vector.load %arg11[%c1_99, %c0_100, %c0_101] : memref<2x8x128xf32, #tpu.memory_space<vmem>>, vector<1x8x128xf32>
    %158 = vector.shape_cast %157 : vector<1x8x128xf32> to vector<8x128xf32>
    %159 = vector.shape_cast %156 : vector<8x128xf32> to vector<1x8x128xf32>
    tpu.vector_store %arg11[%c1_99, %c0_100, %c0_101], %159 {strides = array<i32>} : memref<2x8x128xf32, #tpu.memory_space<vmem>>, vector<1x8x128xf32>,
    %c1_102 = arith.constant 1 : index
    %c0_103 = arith.constant 0 : index
    %c0_104 = arith.constant 0 : index
    %160 = vector.load %arg12[%c1_102, %c0_103, %c0_104] : memref<2x8x128xf32, #tpu.memory_space<vmem>>, vector<1x8x128xf32>
    %161 = vector.shape_cast %160 : vector<1x8x128xf32> to vector<8x128xf32>
    %162 = vector.shape_cast %154 : vector<8x128xf32> to vector<1x8x128xf32>
    tpu.vector_store %arg12[%c1_102, %c0_103, %c0_104], %162 {strides = array<i32>} : memref<2x8x128xf32, #tpu.memory_space<vmem>>, vector<1x8x128xf32>,
    %c0_105 = arith.constant 0 : index
    %c0_106 = arith.constant 0 : index
    %163 = vector.load %arg8[%c0_105, %c0_106] : memref<128x256xf32, #tpu.memory_space<vmem>>, vector<128x256xf32>
    %cst_107 = arith.constant dense<0.000000e+00> : vector<8x256xf32>
    %164 = tpu.matmul %156, %163, %cst_107 {dimension_numbers = #tpu.dot_dimension_numbers<[1], [0], [0], [1], [0, 0, 1, 1], [], []>} : vector<8x128xf32>, vector<128x256xf32>, vector<8x256xf32> -> vector<8x256xf32>
    %c0_108 = arith.constant 0 : index
    %c0_109 = arith.constant 0 : index
    %165 = vector.load %arg9[%c0_108, %c0_109] : memref<1x256xf32, #tpu.memory_space<vmem>>, vector<1x256xf32>
    %166 = vector.broadcast %165 : vector<1x256xf32> to vector<8x256xf32>
    %167 = arith.addf %164, %166 : vector<8x256xf32>
    %c0_110 = arith.constant 0 : index
    %c0_111 = arith.constant 0 : index
    %168 = vector.load %arg10[%c0_110, %c0_111] : memref<8x256xf32, #tpu.memory_space<vmem>>, vector<8x256xf32>
    tpu.vector_store %arg10[%c0_110, %c0_111], %167 {strides = array<i32>} : memref<8x256xf32, #tpu.memory_space<vmem>>, vector<8x256xf32>,
    return
  }
}

</mosaic_0001>

<bundles_post_ra>
// kernel: decoder_forward.1
= control target key start
LH: loop header
LB: loop body
LE: loop exit
PB: predicated region body
PF: predicated region fallthrough
CT: control target
= control target key end

     0   :  { %18 = vsyncpa [#allocation7], 0  ;;  %s2119_s0 = inlined_call_operand.vmem [shape: s32[8], index: 0, kind: input, shape index: {}]   ;;  %s2120_s1 = inlined_call_operand.hbm [shape: f32[200,128], index: 1, kind: input, shape index: {}]   ;;  %s2121_s2 = inlined_call_operand.vmem [shape: f32[2,8,128], index: 2, kind: input, shape index: {}, may-alias: {2,11}]   ;;  %s2122_s3 = inlined_call_operand.vmem [shape: f32[2,8,128], index: 3, kind: input, shape index: {}, may-alias: {3,12}]   ;;  %s2123_s4 = inlined_call_operand.hbm [shape: f32[256,512], index: 4, kind: input, shape index: {}]   ;;  %s2124_s5 = inlined_call_operand.vmem [shape: f32[1,512], index: 5, kind: input, shape index: {}]   ;;  %s2125_s6 = inlined_call_operand.hbm [shape: f32[256,512], index: 6, kind: input, shape index: {}]   ;;  %s2126_s7 = inlined_call_operand.vmem [shape: f32[1,512], index: 7, kind: input, shape index: {}]   ;;  %s2127_s8 = inlined_call_operand.hbm [shape: f32[128,256], index: 8, kind: input, shape index: {}]   ;;  %s2128_s9 = inlined_call_operand.vmem [shape: f32[1,256], index: 9, kind: input, shape index: {}]   ;;  %s2129_s10 = inlined_call_operand.hbm [shape: f32[8,256], index: 10, kind: output, shape index: {0}]   ;;  %s2130_s11 = inlined_call_operand.vmem [shape: f32[2,8,128], index: 11, kind: output, shape index: {1}, may-alias: {2,11}]   ;;  %s2131_s12 = inlined_call_operand.vmem [shape: f32[2,8,128], index: 12, kind: output, shape index: {2}, may-alias: {3,12}]  }
   0x1   :  { %19 = vsyncpa [#allocation5], 0 }
   0x2   :  { %20 = vsyncpa [#allocation10], 0 }
   0x3   :  { %21 = vsyncpa [#allocation6], 0  ;;  %s28_s23 = sshll.u32 %s2119_s0, 4  ;;  %s1787_s24 = smov [#allocation9]   ;;  %s29_s23 = int_to_ptr.vmem [resolvable:$true] %s28_s23 }
   0x4   :  { %s55_s25 = sshll.u32 %s1787_s24, 4  ;;  %s1471_s28 = scalar_lea.hbm %s2125_s6, 16384  ;;  %s56_s25 = int_to_ptr.vmem [resolvable:$true] %s55_s25 }
   0x5   :  { %p1472_p0 = scmp.ne.s32.totalorder %s2125_s6, %s1471_s28  ;;  %p1475_p1 = scmp.lt.u32.totalorder %s1471_s28, %s2125_s6 }
   0x7   :  { %p1477_p2 = pnand %p1475_p1, %p1472_p0 }
   0x9   :  { %1480 = shalt.err (!%p1477_p2)
}
   0xa   :  { %s1481_s15 = scalar_lea.vmem %s56_s25, 16384  ;;  %p1486_p4 = scmp.lt.s32.totalorder %s56_s25, %s56_s25 }
   0xb   :  { %p1482_p3 = scmp.ne.s32.totalorder %s56_s25, %s1481_s15  ;;  %p1487_p5 = scmp.lt.s32.totalorder %s1481_s15, %s1481_s15 }
   0xd   :  { %p1488_p6 = por %p1487_p5, %p1486_p4 }
   0xf   :  { %p1489_p7 = pnand %p1488_p6, %p1482_p3 }
  0x11   :  { %1492 = shalt.err (!%p1489_p7)
}
  0x12   :  { %s1788_s0 = smov 512   ;;  %s1789_s16 = smov 32  }
  0x13   :  { %61 = dma.hbm_to_vmem [thread:$0]  %s2125_s6, 16384, %s56_s25, [#allocation10], %s1788_s0, %s1788_s0, %s1789_s16  }
  0x14   :  { %s1493_s19 = scalar_lea.vmem %s29_s23, 16  ;;  %p1498_p9 = scmp.lt.s32.totalorder %s29_s23, %s29_s23 }
  0x15   :  { %p1494_p8 = scmp.ne.s32.totalorder %s29_s23, %s1493_s19  ;;  %p1499_p10 = scmp.lt.s32.totalorder %s1493_s19, %s1493_s19 }
  0x17   :  { %p1500_p11 = por %p1499_p10, %p1498_p9 }
  0x19   :  { %p1501_p12 = pnand %p1500_p11, %p1494_p8 }
  0x1b   :  { %1504 = shalt.err (!%p1501_p12)
}
  0x1c   :  { %s1790_s20 = smov [#allocation4]   ;;  %s1791_s21 = smov [#allocation8]  }
  0x1d   :  { %31 = dma.vmem_to_smem %s29_s23, 16, %s1790_s20, [#allocation7]  }
  0x1e   :  { %s41_s22 = sshll.u32 %s1791_s21, 4  ;;  %s1792_s24 = smov [#allocation11]   ;;  %s42_s22 = int_to_ptr.vmem [resolvable:$true] %s41_s22 }
  0x1f   :  { %s69_s26 = sshll.u32 %s1792_s24, 4  ;;  %s1505_s6 = scalar_lea.hbm %s2123_s4, 16384  ;;  %s1888_s26 = int_to_ptr.vmem [resolvable:$true] %s69_s26 }
  0x20   :  { %p1506_p13 = scmp.ne.s32.totalorder %s2123_s4, %s1505_s6  ;;  %p1509_p0 = scmp.lt.u32.totalorder %s1505_s6, %s2123_s4 }
  0x22   :  { %p1511_p1 = pnand %p1509_p0, %p1506_p13 }
  0x24   :  { %1514 = shalt.err (!%p1511_p1)
}
  0x25   :  { %s1515_s23 = scalar_lea.vmem %s42_s22, 16384  ;;  %p1520_p3 = scmp.lt.s32.totalorder %s42_s22, %s42_s22 }
  0x26   :  { %p1516_p2 = scmp.ne.s32.totalorder %s42_s22, %s1515_s23  ;;  %p1521_p4 = scmp.lt.s32.totalorder %s1515_s23, %s1515_s23 }
  0x28   :  { %p1522_p5 = por %p1521_p4, %p1520_p3 }
  0x2a   :  { %p1523_p6 = pnand %p1522_p5, %p1516_p2 }
  0x2c   :  { %1526 = shalt.err (!%p1523_p6)
}
  0x2d   :  { %47 = dma.hbm_to_vmem [thread:$0]  %s2123_s4, 16384, %s42_s22, [#allocation5], %s1788_s0, %s1788_s0, %s1789_s16  }
  0x2e   :  { %s1527_s19 = scalar_lea.hbm %s2127_s8, 4096 }
  0x2f   :  { %p1528_p7 = scmp.ne.s32.totalorder %s2127_s8, %s1527_s19  ;;  %p1531_p8 = scmp.lt.u32.totalorder %s1527_s19, %s2127_s8 }
  0x31   :  { %p1533_p9 = pnand %p1531_p8, %p1528_p7 }
  0x33   :  { %1536 = shalt.err (!%p1533_p9)
}
  0x34   :  { %s1537_s28 = scalar_lea.vmem %s1888_s26, 4096  ;;  %p1542_p11 = scmp.lt.s32.totalorder %s1888_s26, %s1888_s26 }
  0x35   :  { %p1538_p10 = scmp.ne.s32.totalorder %s1888_s26, %s1537_s28  ;;  %p1543_p12 = scmp.lt.s32.totalorder %s1537_s28, %s1537_s28 }
  0x37   :  { %p1544_p13 = por %p1543_p12, %p1542_p11 }
  0x39   :  { %p1545_p0 = pnand %p1544_p13, %p1538_p10 }
  0x3b   :  { %1548 = shalt.err (!%p1545_p0)
}
  0x3c   :  { %s1793_s4 = smov 256   ;;  %s1794_s0 = smov 16  }
  0x3d   :  { %75 = dma.hbm_to_vmem [thread:$0]  %s2127_s8, 4096, %s1888_s26, [#allocation10], %s1793_s4, %s1793_s4, %s1794_s0  }
  0x3e   :  { %1763 = dma.done.wait [#allocation7], 16  }
  0x3f   :  { %1764 = vsyncadd [#allocation7], 4294967280 }
  0x40   :  { %1765 = dma.done.wait [#allocation5], 16384  }
  0x41   :  { %1766 = vsyncadd [#allocation5], 4294950912 }
  0x42   :  { %1767 = dma.done.wait [#allocation10], 20480  }
  0x43   :  { %1768 = vsyncadd [#allocation10], 4294946816 }
  0x44   :  { %90 = sfence }
  0x45   :  { %s91_s6 = sld [smem:[#allocation4]]  ;;  %s1795_s25 = smov [#allocation2]  }
  0x46   :  { %s101_s29 = sshll.u32 %s1795_s25, 4  ;;  %s1922_s30 = sld [smem:[#allocation4 + $0x1]]  ;;  %s1924_s29 = int_to_ptr.vmem [resolvable:$true] %s101_s29 }
  0x47   :  { %s1796_s13 = smov [#allocation2 + $0x1]   ;;  %s1926_s14 = sld [smem:[#allocation4 + $0x2]] }
  0x48   :  { %s117_s23 = sshll.u32 %s1796_s13, 4  ;;  %s1797_s8 = smov [#allocation2 + $0x2]   ;;  %s1928_s23 = int_to_ptr.vmem [resolvable:$true] %s117_s23 }
  0x49   :  { %s133_s26 = sshll.u32 %s1797_s8, 4  ;;  %s1930_s15 = sld [smem:[#allocation4 + $0x3]]  ;;  %s1932_s26 = int_to_ptr.vmem [resolvable:$true] %s133_s26 }
  0x4a   :  { %s1941_s4 = scalar_lea.hbm %s2120_s1, 3200 }
  0x4b   :  { %s1100_s17 = sshll.u32 %s91_s6, 4 }
  0x4c   :  { %s93_s20 = scalar_lea.hbm %s2120_s1, %s1100_s17  ;;  %s1102_s21 = sshll.u32 %s1922_s30, 4 }
  0x4d   :  { %s1549_s24 = scalar_lea.hbm %s93_s20, 16  ;;  %p1552_p2 = scmp.lt.u32.totalorder %s93_s20, %s2120_s1 }
  0x4e   :  { %p1550_p1 = scmp.ne.s32.totalorder %s93_s20, %s1549_s24  ;;  %p1553_p3 = scmp.lt.u32.totalorder %s1941_s4, %s1549_s24 }
  0x4f   :  { %p1555_p5 = scmp.lt.u32.totalorder %s1549_s24, %s93_s20 }
  0x50   :  { %p1554_p4 = por %p1553_p3, %p1552_p2 }
  0x52   :  { %p1556_p6 = por %p1555_p5, %p1554_p4 }
  0x54   :  { %p1557_p7 = pnand %p1556_p6, %p1550_p1 }
  0x56   :  { %1560 = shalt.err (!%p1557_p7)  }
  0x57   :  { %s1561_s22 = scalar_lea.vmem %s1924_s29, 16  ;;  %s1950_s6 = scalar_lea.vmem %s1924_s29, 128 }
  0x58   :  { %p1562_p8 = scmp.ne.s32.totalorder %s1924_s29, %s1561_s22  ;;  %p1566_p9 = scmp.lt.s32.totalorder %s1924_s29, %s1924_s29 }
  0x59   :  { %p1567_p10 = scmp.lt.s32.totalorder %s1950_s6, %s1561_s22 }
  0x5b   :  { %p1568_p11 = por %p1567_p10, %p1566_p9 }
  0x5d   :  { %p1569_p12 = pnand %p1568_p11, %p1562_p8 }
  0x5f   :  { %1572 = shalt.err (!%p1569_p12)  }
  0x60   :  { %104 = dma.hbm_to_vmem [thread:$0]  %s93_s20, 16, %s1924_s29, [#allocation3] }
  0x61   :  { %s107_s13 = scalar_lea.hbm %s2120_s1, %s1102_s21  ;;  %s1104_s8 = sshll.u32 %s1926_s14, 4 }
  0x62   :  { %s1573_s17 = scalar_lea.hbm %s107_s13, 16  ;;  %p1576_p0 = scmp.lt.u32.totalorder %s107_s13, %s2120_s1 }
  0x63   :  { %p1574_p13 = scmp.ne.s32.totalorder %s107_s13, %s1573_s17  ;;  %p1577_p1 = scmp.lt.u32.totalorder %s1941_s4, %s1573_s17 }
  0x64   :  { %p1579_p3 = scmp.lt.u32.totalorder %s1573_s17, %s107_s13 }
  0x65   :  { %p1578_p2 = por %p1577_p1, %p1576_p0 }
  0x67   :  { %p1580_p4 = por %p1579_p3, %p1578_p2 }
  0x69   :  { %p1581_p5 = pnand %p1580_p4, %p1574_p13 }
  0x6b   :  { %1584 = shalt.err (!%p1581_p5)  }
  0x6c   :  { %s1585_s20 = scalar_lea.vmem %s1928_s23, 16  ;;  %p1590_p7 = scmp.lt.s32.totalorder %s1928_s23, %s1924_s29 }
  0x6d   :  { %p1586_p6 = scmp.ne.s32.totalorder %s1928_s23, %s1585_s20  ;;  %p1591_p8 = scmp.lt.s32.totalorder %s1950_s6, %s1585_s20 }
  0x6f   :  { %p1592_p9 = por %p1591_p8, %p1590_p7 }
  0x71   :  { %p1593_p10 = pnand %p1592_p9, %p1586_p6 }
  0x73   :  { %1596 = shalt.err (!%p1593_p10)  }
  0x74   :  { %120 = dma.hbm_to_vmem [thread:$0]  %s107_s13, 16, %s1928_s23, [#allocation3 + $0x1] }
  0x75   :  { %s123_s24 = scalar_lea.hbm %s2120_s1, %s1104_s8  ;;  %s1106_s27 = sshll.u32 %s1930_s15, 4 }
  0x76   :  { %s1597_s28 = scalar_lea.hbm %s123_s24, 16  ;;  %p1600_p12 = scmp.lt.u32.totalorder %s123_s24, %s2120_s1 }
  0x77   :  { %p1598_p11 = scmp.ne.s32.totalorder %s123_s24, %s1597_s28  ;;  %p1601_p13 = scmp.lt.u32.totalorder %s1941_s4, %s1597_s28 }
  0x78   :  { %p1603_p1 = scmp.lt.u32.totalorder %s1597_s28, %s123_s24 }
  0x79   :  { %p1602_p0 = por %p1601_p13, %p1600_p12 }
  0x7b   :  { %p1604_p2 = por %p1603_p1, %p1602_p0 }
  0x7d   :  { %p1605_p3 = pnand %p1604_p2, %p1598_p11 }
  0x7f   :  { %1608 = shalt.err (!%p1605_p3)  }
  0x80   :  { %s1609_s23 = scalar_lea.vmem %s1932_s26, 16  ;;  %p1614_p5 = scmp.lt.s32.totalorder %s1932_s26, %s1924_s29 }
  0x81   :  { %p1610_p4 = scmp.ne.s32.totalorder %s1932_s26, %s1609_s23  ;;  %p1615_p6 = scmp.lt.s32.totalorder %s1950_s6, %s1609_s23 }
  0x83   :  { %p1616_p7 = por %p1615_p6, %p1614_p5 }
  0x85   :  { %p1617_p8 = pnand %p1616_p7, %p1610_p4 }
  0x87   :  { %1620 = shalt.err (!%p1617_p8)  }
  0x88   :  { %136 = dma.hbm_to_vmem [thread:$0]  %s123_s24, 16, %s1932_s26, [#allocation3 + $0x2] }
  0x89   :  { %s139_s25 = scalar_lea.hbm %s2120_s1, %s1106_s27  ;;  %s1798_s30 = smov [#allocation2 + $0x3]  }
  0x8a   :  { %s149_s13 = sshll.u32 %s1798_s30, 4  ;;  %s1987_s8 = sld [smem:[#allocation4 + $0x4]]  ;;  %s150_s13 = int_to_ptr.vmem [resolvable:$true] %s149_s13 }
  0x8b   :  { %s1621_s17 = scalar_lea.hbm %s139_s25, 16  ;;  %p1624_p10 = scmp.lt.u32.totalorder %s139_s25, %s2120_s1 }
  0x8c   :  { %p1622_p9 = scmp.ne.s32.totalorder %s139_s25, %s1621_s17  ;;  %p1625_p11 = scmp.lt.u32.totalorder %s1941_s4, %s1621_s17 }
  0x8d   :  { %p1627_p13 = scmp.lt.u32.totalorder %s1621_s17, %s139_s25 }
  0x8e   :  { %p1626_p12 = por %p1625_p11, %p1624_p10 }
  0x90   :  { %p1628_p0 = por %p1627_p13, %p1626_p12 }
  0x92   :  { %p1629_p1 = pnand %p1628_p0, %p1622_p9 }
  0x94   :  { %1632 = shalt.err (!%p1629_p1)  }
  0x95   :  { %s1633_s26 = scalar_lea.vmem %s150_s13, 16  ;;  %p1638_p3 = scmp.lt.s32.totalorder %s150_s13, %s1924_s29 }
  0x96   :  { %p1634_p2 = scmp.ne.s32.totalorder %s150_s13, %s1633_s26  ;;  %p1639_p4 = scmp.lt.s32.totalorder %s1950_s6, %s1633_s26 }
  0x98   :  { %p1640_p5 = por %p1639_p4, %p1638_p3 }
  0x9a   :  { %p1641_p6 = pnand %p1640_p5, %p1634_p2 }
  0x9c   :  { %1644 = shalt.err (!%p1641_p6)  }
  0x9d   :  { %152 = dma.hbm_to_vmem [thread:$0]  %s139_s25, 16, %s150_s13, [#allocation3 + $0x3] }
  0x9e   :  { %s1799_s20 = smov [#allocation2 + $0x4]   ;;  %s1995_s21 = sld [smem:[#allocation4 + $0x5]] }
  0x9f   :  { %s165_s14 = sshll.u32 %s1799_s20, 4  ;;  %s1800_s24 = smov [#allocation2 + $0x5]   ;;  %s166_s14 = int_to_ptr.vmem [resolvable:$true] %s165_s14 }
  0xa0   :  { %s181_s27 = sshll.u32 %s1800_s24, 4  ;;  %s1997_s28 = sld [smem:[#allocation4 + $0x6]]  ;;  %s2000_s27 = int_to_ptr.vmem [resolvable:$true] %s181_s27 }
  0xa1   :  { %s1108_s0 = sshll.u32 %s1987_s8, 4 }
  0xa2   :  { %s155_s15 = scalar_lea.hbm %s2120_s1, %s1108_s0 }
  0xa3   :  { %s1645_s22 = scalar_lea.hbm %s155_s15, 16  ;;  %p1648_p8 = scmp.lt.u32.totalorder %s155_s15, %s2120_s1 }
  0xa4   :  { %p1646_p7 = scmp.ne.s32.totalorder %s155_s15, %s1645_s22  ;;  %p1649_p9 = scmp.lt.u32.totalorder %s1941_s4, %s1645_s22 }
  0xa5   :  { %p1651_p11 = scmp.lt.u32.totalorder %s1645_s22, %s155_s15 }
  0xa6   :  { %p1650_p10 = por %p1649_p9, %p1648_p8 }
  0xa8   :  { %p1652_p12 = por %p1651_p11, %p1650_p10 }
  0xaa   :  { %p1653_p13 = pnand %p1652_p12, %p1646_p7 }
  0xac   :  { %1656 = shalt.err (!%p1653_p13)  }
  0xad   :  { %s1657_s13 = scalar_lea.vmem %s166_s14, 16  ;;  %p1662_p1 = scmp.lt.s32.totalorder %s166_s14, %s1924_s29 }
  0xae   :  { %p1658_p0 = scmp.ne.s32.totalorder %s166_s14, %s1657_s13  ;;  %p1663_p2 = scmp.lt.s32.totalorder %s1950_s6, %s1657_s13 }
  0xb0   :  { %p1664_p3 = por %p1663_p2, %p1662_p1 }
  0xb2   :  { %p1665_p4 = pnand %p1664_p3, %p1658_p0 }
  0xb4   :  { %1668 = shalt.err (!%p1665_p4)  }
  0xb5   :  { %168 = dma.hbm_to_vmem [thread:$0]  %s155_s15, 16, %s166_s14, [#allocation3 + $0x4] }
  0xb6   :  { %s1110_s8 = sshll.u32 %s1995_s21, 4  ;;  %s1801_s17 = smov [#allocation2 + $0x6]  }
  0xb7   :  { %s197_s18 = sshll.u32 %s1801_s17, 4  ;;  %s171_s20 = scalar_lea.hbm %s2120_s1, %s1110_s8  ;;  %s2015_s18 = int_to_ptr.vmem [resolvable:$true] %s197_s18 }
  0xb8   :  { %s1669_s24 = scalar_lea.hbm %s171_s20, 16  ;;  %p1672_p6 = scmp.lt.u32.totalorder %s171_s20, %s2120_s1 }
  0xb9   :  { %p1670_p5 = scmp.ne.s32.totalorder %s171_s20, %s1669_s24  ;;  %p1673_p7 = scmp.lt.u32.totalorder %s1941_s4, %s1669_s24 }
  0xba   :  { %p1675_p9 = scmp.lt.u32.totalorder %s1669_s24, %s171_s20 }
  0xbb   :  { %p1674_p8 = por %p1673_p7, %p1672_p6 }
  0xbd   :  { %p1676_p10 = por %p1675_p9, %p1674_p8 }
  0xbf   :  { %p1677_p11 = pnand %p1676_p10, %p1670_p5 }
  0xc1   :  { %1680 = shalt.err (!%p1677_p11)  }
  0xc2   :  { %s1681_s14 = scalar_lea.vmem %s2000_s27, 16  ;;  %p1686_p13 = scmp.lt.s32.totalorder %s2000_s27, %s1924_s29 }
  0xc3   :  { %p1682_p12 = scmp.ne.s32.totalorder %s2000_s27, %s1681_s14  ;;  %p1687_p0 = scmp.lt.s32.totalorder %s1950_s6, %s1681_s14 }
  0xc5   :  { %p1688_p1 = por %p1687_p0, %p1686_p13 }
  0xc7   :  { %p1689_p2 = pnand %p1688_p1, %p1682_p12 }
  0xc9   :  { %1692 = shalt.err (!%p1689_p2)  }
  0xca   :  { %184 = dma.hbm_to_vmem [thread:$0]  %s171_s20, 16, %s2000_s27, [#allocation3 + $0x5] }
  0xcb   :  { %s1112_s21 = sshll.u32 %s1997_s28, 4  ;;  %s1113_s23 = sld [smem:[#allocation4 + $0x7]] }
  0xcc   :  { %s187_s25 = scalar_lea.hbm %s2120_s1, %s1112_s21 }
  0xcd   :  { %s1693_s30 = scalar_lea.hbm %s187_s25, 16  ;;  %p1696_p4 = scmp.lt.u32.totalorder %s187_s25, %s2120_s1 }
  0xce   :  { %p1694_p3 = scmp.ne.s32.totalorder %s187_s25, %s1693_s30  ;;  %p1697_p5 = scmp.lt.u32.totalorder %s1941_s4, %s1693_s30 }
  0xcf   :  { %p1699_p7 = scmp.lt.u32.totalorder %s1693_s30, %s187_s25 }
  0xd0   :  { %p1698_p6 = por %p1697_p5, %p1696_p4 }
  0xd2   :  { %p1700_p8 = por %p1699_p7, %p1698_p6 }
  0xd4   :  { %p1701_p9 = pnand %p1700_p8, %p1694_p3 }
  0xd6   :  { %1704 = shalt.err (!%p1701_p9)  }
  0xd7   :  { %s1705_s27 = scalar_lea.vmem %s2015_s18, 16  ;;  %p1710_p11 = scmp.lt.s32.totalorder %s2015_s18, %s1924_s29 }
  0xd8   :  { %p1706_p10 = scmp.ne.s32.totalorder %s2015_s18, %s1705_s27  ;;  %p1711_p12 = scmp.lt.s32.totalorder %s1950_s6, %s1705_s27 }
  0xda   :  { %p1712_p13 = por %p1711_p12, %p1710_p11 }
  0xdc   :  { %p1713_p0 = pnand %p1712_p13, %p1706_p10 }
  0xde   :  { %1716 = shalt.err (!%p1713_p0)  }
  0xdf   :  { %200 = dma.hbm_to_vmem [thread:$0]  %s187_s25, 16, %s2015_s18, [#allocation3 + $0x6] }
  0xe0   :  { %s1802_s28 = smov [#allocation2 + $0x7]   ;;  %s1114_s19 = sshll.u32 %s1113_s23, 4 }
  0xe1   :  { %s213_s17 = sshll.u32 %s1802_s28, 4  ;;  %s203_s24 = scalar_lea.hbm %s2120_s1, %s1114_s19  ;;  %s214_s17 = int_to_ptr.vmem [resolvable:$true] %s213_s17 }
  0xe2   :  { %s1717_s0 = scalar_lea.hbm %s203_s24, 16  ;;  %p1720_p2 = scmp.lt.u32.totalorder %s203_s24, %s2120_s1 }
  0xe3   :  { %p1718_p1 = scmp.ne.s32.totalorder %s203_s24, %s1717_s0  ;;  %p1721_p3 = scmp.lt.u32.totalorder %s1941_s4, %s1717_s0 }
  0xe4   :  { %p1723_p5 = scmp.lt.u32.totalorder %s1717_s0, %s203_s24 }
  0xe5   :  { %p1722_p4 = por %p1721_p3, %p1720_p2 }
  0xe7   :  { %p1724_p6 = por %p1723_p5, %p1722_p4 }
  0xe9   :  { %p1725_p7 = pnand %p1724_p6, %p1718_p1 }
  0xeb   :  { %1728 = shalt.err (!%p1725_p7)  }
  0xec   :  { %s1729_s18 = scalar_lea.vmem %s214_s17, 16  ;;  %p1734_p9 = scmp.lt.s32.totalorder %s214_s17, %s1924_s29 }
  0xed   :  { %p1730_p8 = scmp.ne.s32.totalorder %s214_s17, %s1729_s18  ;;  %p1735_p10 = scmp.lt.s32.totalorder %s1950_s6, %s1729_s18 }
  0xef   :  { %p1736_p11 = por %p1735_p10, %p1734_p9 }
  0xf1   :  { %p1737_p12 = pnand %p1736_p11, %p1730_p8 }
  0xf3   :  { %1740 = shalt.err (!%p1737_p12)  }
  0xf4   :  { %216 = dma.hbm_to_vmem [thread:$0]  %s203_s24, 16, %s214_s17, [#allocation3 + $0x7] }
  0xf5   :  { %1769 = dma.done.wait [#allocation3], 16 }
  0xf6   :  { %1770 = vsyncadd [#allocation3], 4294967280 }
  0xf7   :  { %1771 = dma.done.wait [#allocation3 + $0x1], 16 }
  0xf8   :  { %1772 = vsyncadd [#allocation3 + $0x1], 4294967280 }
  0xf9   :  { %1773 = dma.done.wait [#allocation3 + $0x2], 16 }
  0xfa   :  { %1774 = vsyncadd [#allocation3 + $0x2], 4294967280 }
  0xfb   :  { %1775 = dma.done.wait [#allocation3 + $0x3], 16 }
  0xfc   :  { %1776 = vsyncadd [#allocation3 + $0x3], 4294967280 }
  0xfd   :  { %1777 = dma.done.wait [#allocation3 + $0x4], 16 }
  0xfe   :  { %1778 = vsyncadd [#allocation3 + $0x4], 4294967280 }
  0xff   :  { %1779 = dma.done.wait [#allocation3 + $0x5], 16 }
 0x100   :  { %1780 = vsyncadd [#allocation3 + $0x5], 4294967280 }
 0x101   :  { %1781 = dma.done.wait [#allocation3 + $0x6], 16 }
 0x102   :  { %1782 = vsyncadd [#allocation3 + $0x6], 4294967280 }
 0x103   :  { %1783 = dma.done.wait [#allocation3 + $0x7], 16 }
 0x104   :  { %1784 = vsyncadd [#allocation3 + $0x7], 4294967280  ;;  %v246_v0 = vld [vmem:[#allocation8 + $0x8] sm:$0xff]  ;;  %v245_v2 = vld [vmem:[#allocation8] sm:$0xff]  ;;  %s1804_s24 = smov [#allocation12]  }
 0x105   :  { %v250_v1 = vld [vmem:[#allocation8 + $0x28] sm:$0xff]  ;;  %v249_v4 = vld [vmem:[#allocation8 + $0x20] sm:$0xff]  ;;  %v248_v18 = vld [vmem:[#allocation8 + $0x18] sm:$0xff]  ;;  %s1010_s0 = sshll.u32 %s1804_s24, 4  ;;  %s1011_s0 = int_to_ptr.vmem [resolvable:$true] %s1010_s0 }
 0x106   :  { %v1133_v3 = vpack.c.bf16 %v250_v1, %v246_v0  ;;  %v254_v5 = vld [vmem:[#allocation8 + $0x48] sm:$0xff]  ;;  %v1135_v7 = vpack.c.bf16 %v249_v4, %v245_v2  ;;  %v253_v9 = vld [vmem:[#allocation8 + $0x40] sm:$0xff]  ;;  %v252_v19 = vld [vmem:[#allocation8 + $0x38] sm:$0xff]  ;;  %p1746_p0 = scmp.lt.s32.totalorder %s1011_s0, %s1011_s0 }
 0x107   :  { %v258_v6 = vld [vmem:[#allocation8 + $0x68] sm:$0xff]  ;;  %v257_v10 = vld [vmem:[#allocation8 + $0x60] sm:$0xff]  ;;  %v1197_v21 = vpack.c.bf16 %v252_v19, %v248_v18  ;;  %v247_v22 = vld [vmem:[#allocation8 + $0x10] sm:$0xff] }
 0x108   :  { %v1137_v8 = vpack.c.bf16 %v258_v6, %v254_v5  ;;  %v262_v11 = vld [vmem:[#allocation8 + $0x88] sm:$0xff]  ;;  %1134 = vmatprep.subr.bf16.mxu0 %v1133_v3  ;;  %v1139_v13 = vpack.c.bf16 %v257_v10, %v253_v9  ;;  %v261_v14 = vld [vmem:[#allocation8 + $0x80] sm:$0xff]  ;;  %v251_v23 = vld [vmem:[#allocation8 + $0x30] sm:$0xff] }
 0x109   :  { %v266_v12 = vld [vmem:[#allocation8 + $0xa8] sm:$0xff]  ;;  %1136 = vmatpush1.bf16.msra.mxu0 %v1135_v7  ;;  %v265_v15 = vld [vmem:[#allocation8 + $0xa0] sm:$0xff]  ;;  %v1199_v24 = vpack.c.bf16 %v251_v23, %v247_v22  ;;  %1198 = vmatprep.subr.bf16.mxu1 %v1197_v21  ;;  %v256_v26 = vld [vmem:[#allocation8 + $0x58] sm:$0xff] }
 0x10a   :  { %1138 = vmatprep.subr.bf16.mxu0 %v1137_v8  ;;  %v1141_v16 = vpack.c.bf16 %v266_v12, %v262_v11  ;;  %v270_v17 = vld [vmem:[#allocation8 + $0xc8] sm:$0xff]  ;;  %v1143_v25 = vpack.c.bf16 %v265_v15, %v261_v14  ;;  %v260_v27 = vld [vmem:[#allocation8 + $0x78] sm:$0xff]  ;;  %v255_v28 = vld [vmem:[#allocation8 + $0x50] sm:$0xff] }
 0x10b   :  { %v274_v20 = vld [vmem:[#allocation8 + $0xe8] sm:$0xff]  ;;  %v269_v30 = vld [vmem:[#allocation8 + $0xc0] sm:$0xff]  ;;  %1200 = vmatpush1.bf16.msra.mxu1 %v1199_v24  ;;  %v1201_v32 = vpack.c.bf16 %v260_v27, %v256_v26  ;;  %v259_v33 = vld [vmem:[#allocation8 + $0x70] sm:$0xff] }
 0x10c   :  { %v1145_v29 = vpack.c.bf16 %v274_v20, %v270_v17  ;;  %v273_v31 = vld [vmem:[#allocation8 + $0xe0] sm:$0xff]  ;;  %v278_v34 = vld [vmem:[#allocation8 + $0x108] sm:$0xff]  ;;  %v1203_v36 = vpack.c.bf16 %v259_v33, %v255_v28  ;;  %v264_v37 = vld [vmem:[#allocation8 + $0x98] sm:$0xff] }
 0x10d   :  { %1140 = vmatpush1.bf16.msra.mxu0 %v1139_v13  ;;  %v282_v35 = vld [vmem:[#allocation8 + $0x128] sm:$0xff]  ;;  %1202 = vmatprep.subr.bf16.mxu1 %v1201_v32  ;;  %v268_v38 = vld [vmem:[#allocation8 + $0xb8] sm:$0xff]  ;;  %v263_v39 = vld [vmem:[#allocation8 + $0x90] sm:$0xff]  ;;  %v1147_v41 = vpack.c.bf16 %v273_v31, %v269_v30 }
 0x10e   :  { %1142 = vmatprep.subr.bf16.mxu0 %v1141_v16  ;;  %v267_v40 = vld [vmem:[#allocation8 + $0xb0] sm:$0xff]  ;;  %v277_v42 = vld [vmem:[#allocation8 + $0x100] sm:$0xff]  ;;  %v1205_v44 = vpack.c.bf16 %v268_v38, %v264_v37  ;;  %v1149_v45 = vpack.c.bf16 %v282_v35, %v278_v34  ;;  %v286_v46 = vld [vmem:[#allocation8 + $0x148] sm:$0xff] }
 0x10f   :  { %v281_v43 = vld [vmem:[#allocation8 + $0x120] sm:$0xff]  ;;  %1204 = vmatpush1.bf16.msra.mxu1 %v1203_v36  ;;  %v1207_v47 = vpack.c.bf16 %v267_v40, %v263_v39  ;;  %v272_v48 = vld [vmem:[#allocation8 + $0xd8] sm:$0xff]  ;;  %v290_v50 = vld [vmem:[#allocation8 + $0x168] sm:$0xff] }
 0x110   :  { %v276_v49 = vld [vmem:[#allocation8 + $0xf8] sm:$0xff]  ;;  %1206 = vmatprep.subr.bf16.mxu1 %v1205_v44  ;;  %v271_v52 = vld [vmem:[#allocation8 + $0xd0] sm:$0xff]  ;;  %v1151_v54 = vpack.c.bf16 %v281_v43, %v277_v42  ;;  %v1153_v57 = vpack.c.bf16 %v290_v50, %v286_v46  ;;  %v285_v58 = vld [vmem:[#allocation8 + $0x140] sm:$0xff] }
 0x111   :  { %1144 = vmatpush1.bf16.msra.mxu0 %v1143_v25  ;;  %v1209_v51 = vpack.c.bf16 %v276_v49, %v272_v48  ;;  %v275_v53 = vld [vmem:[#allocation8 + $0xf0] sm:$0xff]  ;;  %v280_v55 = vld [vmem:[#allocation8 + $0x118] sm:$0xff]  ;;  %v289_v59 = vld [vmem:[#allocation8 + $0x160] sm:$0xff] }
 0x112   :  { %1146 = vmatprep.subr.bf16.mxu0 %v1145_v29  ;;  %v284_v56 = vld [vmem:[#allocation8 + $0x138] sm:$0xff]  ;;  %v294_v60 = vld [vmem:[#allocation8 + $0x188] sm:$0xff]  ;;  %v1211_v61 = vpack.c.bf16 %v275_v53, %v271_v52  ;;  %v279_v0 = vld [vmem:[#allocation8 + $0x110] sm:$0xff]  ;;  %v1155_v4 = vpack.c.bf16 %v289_v59, %v285_v58 }
 0x113   :  { %1208 = vmatpush1.bf16.msra.mxu1 %v1207_v47  ;;  %v298_v62 = vld [vmem:[#allocation8 + $0x1a8] sm:$0xff]  ;;  %v1213_v63 = vpack.c.bf16 %v284_v56, %v280_v55  ;;  %v283_v1 = vld [vmem:[#allocation8 + $0x130] sm:$0xff]  ;;  %v288_v2 = vld [vmem:[#allocation8 + $0x158] sm:$0xff] }
 0x114   :  { %1210 = vmatprep.subr.bf16.mxu1 %v1209_v51  ;;  %v292_v3 = vld [vmem:[#allocation8 + $0x178] sm:$0xff]  ;;  %v1157_v5 = vpack.c.bf16 %v298_v62, %v294_v60  ;;  %v293_v6 = vld [vmem:[#allocation8 + $0x180] sm:$0xff]  ;;  %v302_v8 = vld [vmem:[#allocation8 + $0x1c8] sm:$0xff]  ;;  %v1215_v9 = vpack.c.bf16 %v283_v1, %v279_v0 }
 0x115   :  { %1148 = vmatpush1.bf16.msra.mxu0 %v1147_v41  ;;  %v297_v7 = vld [vmem:[#allocation8 + $0x1a0] sm:$0xff]  ;;  %v306_v10 = vld [vmem:[#allocation8 + $0x1e8] sm:$0xff]  ;;  %v1217_v11 = vpack.c.bf16 %v292_v3, %v288_v2  ;;  %v287_v12 = vld [vmem:[#allocation8 + $0x150] sm:$0xff] }
 0x116   :  { %1150 = vmatprep.subr.bf16.mxu0 %v1149_v45  ;;  %v291_v13 = vld [vmem:[#allocation8 + $0x170] sm:$0xff]  ;;  %v296_v14 = vld [vmem:[#allocation8 + $0x198] sm:$0xff]  ;;  %v1159_v16 = vpack.c.bf16 %v297_v7, %v293_v6  ;;  %v1161_v17 = vpack.c.bf16 %v306_v10, %v302_v8  ;;  %v301_v18 = vld [vmem:[#allocation8 + $0x1c0] sm:$0xff] }
 0x117   :  { %1212 = vmatpush1.bf16.msra.mxu1 %v1211_v61  ;;  %v300_v15 = vld [vmem:[#allocation8 + $0x1b8] sm:$0xff]  ;;  %v305_v19 = vld [vmem:[#allocation8 + $0x1e0] sm:$0xff]  ;;  %v310_v20 = vld [vmem:[#allocation8 + $0x208] sm:$0xff]  ;;  %v1219_v21 = vpack.c.bf16 %v291_v13, %v287_v12 }
 0x118   :  { %1214 = vmatprep.subr.bf16.mxu1 %v1213_v63  ;;  %v314_v22 = vld [vmem:[#allocation8 + $0x228] sm:$0xff]  ;;  %v1221_v23 = vpack.c.bf16 %v300_v15, %v296_v14  ;;  %v295_v24 = vld [vmem:[#allocation8 + $0x190] sm:$0xff]  ;;  %v304_v26 = vld [vmem:[#allocation8 + $0x1d8] sm:$0xff]  ;;  %v1163_v28 = vpack.c.bf16 %v305_v19, %v301_v18 }
 0x119   :  { %1152 = vmatpush1.bf16.msra.mxu0 %v1151_v54  ;;  %v299_v25 = vld [vmem:[#allocation8 + $0x1b0] sm:$0xff]  ;;  %v308_v27 = vld [vmem:[#allocation8 + $0x1f8] sm:$0xff]  ;;  %v1165_v29 = vpack.c.bf16 %v314_v22, %v310_v20  ;;  %v309_v30 = vld [vmem:[#allocation8 + $0x200] sm:$0xff] }
 0x11a   :  { %1154 = vmatprep.subr.bf16.mxu0 %v1153_v57  ;;  %v313_v31 = vld [vmem:[#allocation8 + $0x220] sm:$0xff]  ;;  %v318_v32 = vld [vmem:[#allocation8 + $0x248] sm:$0xff]  ;;  %v1223_v33 = vpack.c.bf16 %v299_v25, %v295_v24  ;;  %v1225_v35 = vpack.c.bf16 %v308_v27, %v304_v26  ;;  %v303_v36 = vld [vmem:[#allocation8 + $0x1d0] sm:$0xff] }
 0x11b   :  { %1216 = vmatpush1.bf16.msra.mxu1 %v1215_v9  ;;  %v322_v34 = vld [vmem:[#allocation8 + $0x268] sm:$0xff]  ;;  %v307_v37 = vld [vmem:[#allocation8 + $0x1f0] sm:$0xff]  ;;  %v312_v38 = vld [vmem:[#allocation8 + $0x218] sm:$0xff]  ;;  %v1167_v40 = vpack.c.bf16 %v313_v31, %v309_v30 }
 0x11c   :  { %1218 = vmatprep.subr.bf16.mxu1 %v1217_v11  ;;  %v316_v39 = vld [vmem:[#allocation8 + $0x238] sm:$0xff]  ;;  %v1169_v41 = vpack.c.bf16 %v322_v34, %v318_v32  ;;  %v317_v42 = vld [vmem:[#allocation8 + $0x240] sm:$0xff]  ;;  %v326_v44 = vld [vmem:[#allocation8 + $0x288] sm:$0xff]  ;;  %v1227_v45 = vpack.c.bf16 %v307_v37, %v303_v36 }
 0x11d   :  { %1156 = vmatpush1.bf16.msra.mxu0 %v1155_v4  ;;  %v321_v43 = vld [vmem:[#allocation8 + $0x260] sm:$0xff]  ;;  %v330_v46 = vld [vmem:[#allocation8 + $0x2a8] sm:$0xff]  ;;  %v1229_v47 = vpack.c.bf16 %v316_v39, %v312_v38  ;;  %v311_v48 = vld [vmem:[#allocation8 + $0x210] sm:$0xff] }
 0x11e   :  { %1158 = vmatprep.subr.bf16.mxu0 %v1157_v5  ;;  %v315_v49 = vld [vmem:[#allocation8 + $0x230] sm:$0xff]  ;;  %v320_v50 = vld [vmem:[#allocation8 + $0x258] sm:$0xff]  ;;  %v1171_v52 = vpack.c.bf16 %v321_v43, %v317_v42  ;;  %v325_v53 = vld [vmem:[#allocation8 + $0x280] sm:$0xff]  ;;  %v1173_v54 = vpack.c.bf16 %v330_v46, %v326_v44 }
 0x11f   :  { %1220 = vmatpush1.bf16.msra.mxu1 %v1219_v21  ;;  %v324_v51 = vld [vmem:[#allocation8 + $0x278] sm:$0xff]  ;;  %v329_v55 = vld [vmem:[#allocation8 + $0x2a0] sm:$0xff]  ;;  %v334_v56 = vld [vmem:[#allocation8 + $0x2c8] sm:$0xff]  ;;  %v1231_v58 = vpack.c.bf16 %v315_v49, %v311_v48 }
 0x120   :  { %1222 = vmatprep.subr.bf16.mxu1 %v1221_v23  ;;  %v338_v57 = vld [vmem:[#allocation8 + $0x2e8] sm:$0xff]  ;;  %v1233_v59 = vpack.c.bf16 %v324_v51, %v320_v50  ;;  %v319_v60 = vld [vmem:[#allocation8 + $0x250] sm:$0xff]  ;;  %v243_v62 = vld [vmem:[%s2121_s2] sm:$0xff]  ;;  %v1175_v1 = vpack.c.bf16 %v329_v55, %v325_v53 }
 0x121   :  { %1160 = vmatpush1.bf16.msra.mxu0 %v1159_v16  ;;  %v323_v61 = vld [vmem:[#allocation8 + $0x270] sm:$0xff]  ;;  %v328_v63 = vld [vmem:[#allocation8 + $0x298] sm:$0xff]  ;;  %459 = vmatprep.mubr.f32.mxu0 %v243_v62  ;;  %v1177_v2 = vpack.c.bf16 %v338_v57, %v334_v56  ;;  %v333_v3 = vld [vmem:[#allocation8 + $0x2c0] sm:$0xff] }
 0x122   :  { %1162 = vmatprep.subr.bf16.mxu0 %v1161_v17  ;;  %v332_v0 = vld [vmem:[#allocation8 + $0x2b8] sm:$0xff]  ;;  %530 = vmatprep.mubr.f32.mxu1 %v243_v62  ;;  %v337_v4 = vld [vmem:[#allocation8 + $0x2e0] sm:$0xff]  ;;  %v342_v5 = vld [vmem:[#allocation8 + $0x308] sm:$0xff]  ;;  %v1235_v6 = vpack.c.bf16 %v323_v61, %v319_v60 }
 0x123   :  { %1224 = vmatpush1.bf16.msra.mxu1 %v1223_v33  ;;  %v346_v7 = vld [vmem:[#allocation8 + $0x328] sm:$0xff]  ;;  %v1237_v8 = vpack.c.bf16 %v332_v0, %v328_v63  ;;  %v327_v9 = vld [vmem:[#allocation8 + $0x290] sm:$0xff]  ;;  %v336_v11 = vld [vmem:[#allocation8 + $0x2d8] sm:$0xff]  ;;  %v1179_v13 = vpack.c.bf16 %v337_v4, %v333_v3 }
 0x124   :  { %1226 = vmatprep.subr.bf16.mxu1 %v1225_v35  ;;  %v331_v10 = vld [vmem:[#allocation8 + $0x2b0] sm:$0xff]  ;;  %v340_v12 = vld [vmem:[#allocation8 + $0x2f8] sm:$0xff]  ;;  %v1181_v14 = vpack.c.bf16 %v346_v7, %v342_v5  ;;  %v341_v15 = vld [vmem:[#allocation8 + $0x300] sm:$0xff] }
 0x125   :  { %1164 = vmatpush1.bf16.msra.mxu0 %v1163_v28  ;;  %v345_v16 = vld [vmem:[#allocation8 + $0x320] sm:$0xff]  ;;  %v350_v17 = vld [vmem:[#allocation8 + $0x348] sm:$0xff]  ;;  %v1239_v18 = vpack.c.bf16 %v331_v10, %v327_v9  ;;  %v1241_v20 = vpack.c.bf16 %v340_v12, %v336_v11  ;;  %v335_v21 = vld [vmem:[#allocation8 + $0x2d0] sm:$0xff] }
 0x126   :  { %1166 = vmatprep.subr.bf16.mxu0 %v1165_v29  ;;  %v354_v19 = vld [vmem:[#allocation8 + $0x368] sm:$0xff]  ;;  %v339_v22 = vld [vmem:[#allocation8 + $0x2f0] sm:$0xff]  ;;  %v344_v23 = vld [vmem:[#allocation8 + $0x318] sm:$0xff]  ;;  %v1183_v25 = vpack.c.bf16 %v345_v16, %v341_v15 }
 0x127   :  { %1228 = vmatpush1.bf16.msra.mxu1 %v1227_v45  ;;  %v348_v24 = vld [vmem:[#allocation8 + $0x338] sm:$0xff]  ;;  %v1185_v26 = vpack.c.bf16 %v354_v19, %v350_v17  ;;  %v349_v27 = vld [vmem:[#allocation8 + $0x340] sm:$0xff]  ;;  %v358_v29 = vld [vmem:[#allocation8 + $0x388] sm:$0xff]  ;;  %v1243_v30 = vpack.c.bf16 %v339_v22, %v335_v21 }
 0x128   :  { %1230 = vmatprep.subr.bf16.mxu1 %v1229_v47  ;;  %v353_v28 = vld [vmem:[#allocation8 + $0x360] sm:$0xff]  ;;  %v362_v31 = vld [vmem:[#allocation8 + $0x3a8] sm:$0xff]  ;;  %v1245_v32 = vpack.c.bf16 %v348_v24, %v344_v23  ;;  %v343_v33 = vld [vmem:[#allocation8 + $0x310] sm:$0xff] }
 0x129   :  { %1168 = vmatpush1.bf16.msra.mxu0 %v1167_v40  ;;  %v347_v34 = vld [vmem:[#allocation8 + $0x330] sm:$0xff]  ;;  %v352_v35 = vld [vmem:[#allocation8 + $0x358] sm:$0xff]  ;;  %v1187_v37 = vpack.c.bf16 %v353_v28, %v349_v27  ;;  %v1189_v38 = vpack.c.bf16 %v362_v31, %v358_v29  ;;  %v357_v39 = vld [vmem:[#allocation8 + $0x380] sm:$0xff] }
 0x12a   :  { %1170 = vmatprep.subr.bf16.mxu0 %v1169_v41  ;;  %v356_v36 = vld [vmem:[#allocation8 + $0x378] sm:$0xff]  ;;  %v361_v40 = vld [vmem:[#allocation8 + $0x3a0] sm:$0xff]  ;;  %v366_v41 = vld [vmem:[#allocation8 + $0x3c8] sm:$0xff]  ;;  %v1247_v42 = vpack.c.bf16 %v347_v34, %v343_v33 }
 0x12b   :  { %1232 = vmatpush1.bf16.msra.mxu1 %v1231_v58  ;;  %v370_v43 = vld [vmem:[#allocation8 + $0x3e8] sm:$0xff]  ;;  %v1249_v44 = vpack.c.bf16 %v356_v36, %v352_v35  ;;  %v351_v45 = vld [vmem:[#allocation8 + $0x350] sm:$0xff]  ;;  %v360_v47 = vld [vmem:[#allocation8 + $0x398] sm:$0xff]  ;;  %v1191_v49 = vpack.c.bf16 %v361_v40, %v357_v39 }
 0x12c   :  { %1234 = vmatprep.subr.bf16.mxu1 %v1233_v59  ;;  %v355_v46 = vld [vmem:[#allocation8 + $0x370] sm:$0xff]  ;;  %v364_v48 = vld [vmem:[#allocation8 + $0x3b8] sm:$0xff]  ;;  %v1193_v50 = vpack.c.bf16 %v370_v43, %v366_v41  ;;  %v365_v51 = vld [vmem:[#allocation8 + $0x3c0] sm:$0xff] }
 0x12d   :  { %1172 = vmatpush1.bf16.msra.mxu0 %v1171_v52  ;;  %v369_v52 = vld [vmem:[#allocation8 + $0x3e0] sm:$0xff]  ;;  %v1251_v53 = vpack.c.bf16 %v355_v46, %v351_v45  ;;  %v1253_v55 = vpack.c.bf16 %v364_v48, %v360_v47  ;;  %v363_v56 = vld [vmem:[#allocation8 + $0x3b0] sm:$0xff]  ;;  %v568_v57 = vld [vmem:[#allocation9 + $0x8] sm:$0xff] }
 0x12e   :  { %1174 = vmatprep.subr.bf16.mxu0 %v1173_v54  ;;  %v359_v54 = vld [vmem:[#allocation8 + $0x390] sm:$0xff]  ;;  %v572_v58 = vld [vmem:[#allocation9 + $0x28] sm:$0xff]  ;;  %v368_v59 = vld [vmem:[#allocation8 + $0x3d8] sm:$0xff]  ;;  %v1195_v61 = vpack.c.bf16 %v369_v52, %v365_v51 }
 0x12f   :  { %1236 = vmatpush1.bf16.msra.mxu1 %v1235_v6  ;;  %v372_v60 = vld [vmem:[#allocation8 + $0x3f8] sm:$0xff]  ;;  %v1255_v62 = vpack.c.bf16 %v363_v56, %v359_v54  ;;  %v367_v63 = vld [vmem:[#allocation8 + $0x3d0] sm:$0xff]  ;;  %v1261_v0 = vpack.c.bf16 %v572_v58, %v568_v57  ;;  %v576_v5 = vld [vmem:[#allocation9 + $0x48] sm:$0xff] }
 0x130   :  { %1238 = vmatprep.subr.bf16.mxu1 %v1237_v8  ;;  %v1257_v3 = vpack.c.bf16 %v372_v60, %v368_v59  ;;  %v371_v4 = vld [vmem:[#allocation8 + $0x3f0] sm:$0xff]  ;;  %v580_v6 = vld [vmem:[#allocation9 + $0x68] sm:$0xff]  ;;  %v570_v7 = vld [vmem:[#allocation9 + $0x18] sm:$0xff] }
 0x131   :  { %1176 = vmatpush1.bf16.msra.mxu0 %v1175_v1  ;;  %v567_v1 = vld [vmem:[#allocation9] sm:$0xff]  ;;  %v574_v8 = vld [vmem:[#allocation9 + $0x38] sm:$0xff]  ;;  %v1259_v11 = vpack.c.bf16 %v371_v4, %v367_v63  ;;  %v569_v12 = vld [vmem:[#allocation9 + $0x10] sm:$0xff] }
 0x132   :  { %1178 = vmatprep.subr.bf16.mxu0 %v1177_v2  ;;  %v571_v2 = vld [vmem:[#allocation9 + $0x20] sm:$0xff]  ;;  %v242_v9 = vld [vmem:[#allocation2] sm:$0xff]  ;;  %v1325_v16 = vpack.c.bf16 %v574_v8, %v570_v7  ;;  %v573_v17 = vld [vmem:[#allocation9 + $0x30] sm:$0xff] }
 0x133   :  { %1240 = vmatpush1.bf16.msra.mxu1 %v1239_v18  ;;  %v1263_v10 = vpack.c.bf16 %v571_v2, %v567_v1  ;;  %v579_v15 = vld [vmem:[#allocation9 + $0x60] sm:$0xff]  ;;  %v584_v18 = vld [vmem:[#allocation9 + $0x88] sm:$0xff]  ;;  %v582_v21 = vld [vmem:[#allocation9 + $0x78] sm:$0xff]  ;;  %v1327_v23 = vpack.c.bf16 %v573_v17, %v569_v12 }
 0x134   :  { %1242 = vmatprep.subr.bf16.mxu1 %v1241_v20  ;;  %v588_v19 = vld [vmem:[#allocation9 + $0xa8] sm:$0xff]  ;;  %v578_v20 = vld [vmem:[#allocation9 + $0x58] sm:$0xff]  ;;  %v577_v24 = vld [vmem:[#allocation9 + $0x50] sm:$0xff] }
 0x135   :  { %1180 = vmatpush1.bf16.msra.mxu0 %v1179_v13  ;;  %v1265_v13 = vpack.c.bf16 %v580_v6, %v576_v5  ;;  %v587_v27 = vld [vmem:[#allocation9 + $0xa0] sm:$0xff]  ;;  %v1329_v28 = vpack.c.bf16 %v582_v21, %v578_v20  ;;  %v581_v29 = vld [vmem:[#allocation9 + $0x70] sm:$0xff]  ;;  %v596_v31 = vld [vmem:[#allocation9 + $0xe8] sm:$0xff] }
 0x136   :  { %1182 = vmatprep.subr.bf16.mxu0 %v1181_v14  ;;  %v575_v14 = vld [vmem:[#allocation9 + $0x40] sm:$0xff]  ;;  %v590_v33 = vld [vmem:[#allocation9 + $0xb8] sm:$0xff]  ;;  %v1331_v35 = vpack.c.bf16 %v581_v29, %v577_v24  ;;  %v585_v36 = vld [vmem:[#allocation9 + $0x90] sm:$0xff] }
 0x137   :  { %1244 = vmatpush1.bf16.msra.mxu1 %v1243_v30  ;;  %v1267_v22 = vpack.c.bf16 %v579_v15, %v575_v14  ;;  %v592_v30 = vld [vmem:[#allocation9 + $0xc8] sm:$0xff]  ;;  %v595_v39 = vld [vmem:[#allocation9 + $0xe0] sm:$0xff]  ;;  %v589_v41 = vld [vmem:[#allocation9 + $0xb0] sm:$0xff] }
 0x138   :  { %1246 = vmatprep.subr.bf16.mxu1 %v1245_v32  ;;  %v586_v32 = vld [vmem:[#allocation9 + $0x98] sm:$0xff]  ;;  %v604_v43 = vld [vmem:[#allocation9 + $0x128] sm:$0xff]  ;;  %v1335_v47 = vpack.c.bf16 %v589_v41, %v585_v36  ;;  %v597_v51 = vld [vmem:[#allocation9 + $0xf0] sm:$0xff] }
 0x139   :  { %1184 = vmatpush1.bf16.msra.mxu0 %v1183_v25  ;;  %v1269_v25 = vpack.c.bf16 %v588_v19, %v584_v18  ;;  %v1333_v40 = vpack.c.bf16 %v590_v33, %v586_v32  ;;  %v598_v45 = vld [vmem:[#allocation9 + $0xf8] sm:$0xff]  ;;  %v599_v56 = vld [vmem:[#allocation9 + $0x100] sm:$0xff]  ;;  %v601_v58 = vld [vmem:[#allocation9 + $0x110] sm:$0xff] }
 0x13a   :  { %1186 = vmatprep.subr.bf16.mxu0 %v1185_v26  ;;  %v583_v26 = vld [vmem:[#allocation9 + $0x80] sm:$0xff]  ;;  %v602_v52 = vld [vmem:[#allocation9 + $0x118] sm:$0xff]  ;;  %v605_v60 = vld [vmem:[#allocation9 + $0x130] sm:$0xff] }
 0x13b   :  { %1248 = vmatpush1.bf16.msra.mxu1 %v1247_v42  ;;  %v1271_v34 = vpack.c.bf16 %v587_v27, %v583_v26  ;;  %v600_v42 = vld [vmem:[#allocation9 + $0x108] sm:$0xff]  ;;  %v603_v57 = vld [vmem:[#allocation9 + $0x120] sm:$0xff]  ;;  %v614_v2 = vld [vmem:[#allocation9 + $0x178] sm:$0xff] }
 0x13c   :  { %1250 = vmatprep.subr.bf16.mxu1 %v1249_v44  ;;  %v594_v44 = vld [vmem:[#allocation9 + $0xd8] sm:$0xff]  ;;  %v1277_v48 = vpack.c.bf16 %v604_v43, %v600_v42  ;;  %v1279_v59 = vpack.c.bf16 %v603_v57, %v599_v56  ;;  %v612_v63 = vld [vmem:[#allocation9 + $0x168] sm:$0xff]  ;;  %v611_v4 = vld [vmem:[#allocation9 + $0x160] sm:$0xff] }
 0x13d   :  { %1188 = vmatpush1.bf16.msra.mxu0 %v1187_v37  ;;  %v1273_v37 = vpack.c.bf16 %v596_v31, %v592_v30  ;;  %v609_v7 = vld [vmem:[#allocation9 + $0x150] sm:$0xff]  ;;  %v618_v12 = vld [vmem:[#allocation9 + $0x198] sm:$0xff]  ;;  %v615_v15 = vld [vmem:[#allocation9 + $0x180] sm:$0xff] }
 0x13e   :  { %1190 = vmatprep.subr.bf16.mxu0 %v1189_v38  ;;  %v591_v38 = vld [vmem:[#allocation9 + $0xc0] sm:$0xff]  ;;  %v613_v8 = vld [vmem:[#allocation9 + $0x170] sm:$0xff]  ;;  %v622_v14 = vld [vmem:[#allocation9 + $0x1b8] sm:$0xff] }
 0x13f   :  { %1252 = vmatpush1.bf16.msra.mxu1 %v1251_v53  ;;  %v1275_v46 = vpack.c.bf16 %v595_v39, %v591_v38  ;;  %v606_v53 = vld [vmem:[#allocation9 + $0x138] sm:$0xff]  ;;  %v1349_v17 = vpack.c.bf16 %v622_v14, %v618_v12  ;;  %v617_v19 = vld [vmem:[#allocation9 + $0x190] sm:$0xff]  ;;  %v623_v27 = vld [vmem:[#allocation9 + $0x1c0] sm:$0xff] }
 0x140   :  { %1254 = vmatprep.subr.bf16.mxu1 %v1253_v55  ;;  %v1341_v55 = vpack.c.bf16 %v606_v53, %v602_v52  ;;  %v621_v20 = vld [vmem:[#allocation9 + $0x1b0] sm:$0xff]  ;;  %v626_v24 = vld [vmem:[#allocation9 + $0x1d8] sm:$0xff]  ;;  %v631_v39 = vld [vmem:[#allocation9 + $0x200] sm:$0xff] }
 0x141   :  { %1192 = vmatpush1.bf16.msra.mxu0 %v1191_v49  ;;  %v1337_v49 = vpack.c.bf16 %v598_v45, %v594_v44  ;;  %v1351_v21 = vpack.c.bf16 %v621_v20, %v617_v19  ;;  %v630_v26 = vld [vmem:[#allocation9 + $0x1f8] sm:$0xff]  ;;  %v625_v31 = vld [vmem:[#allocation9 + $0x1d0] sm:$0xff]  ;;  %v643_v52 = vld [vmem:[#allocation9 + $0x260] sm:$0xff] }
 0x142   :  { %1194 = vmatprep.subr.bf16.mxu0 %v1193_v50  ;;  %v593_v50 = vld [vmem:[#allocation9 + $0xd0] sm:$0xff]  ;;  %v1353_v29 = vpack.c.bf16 %v630_v26, %v626_v24  ;;  %v634_v36 = vld [vmem:[#allocation9 + $0x218] sm:$0xff]  ;;  %v659_v12 = vld [vmem:[#allocation9 + $0x2e0] sm:$0xff] }
 0x143   :  { %1256 = vmatpush1.bf16.msra.mxu1 %v1255_v62  ;;  %v1339_v54 = vpack.c.bf16 %v597_v51, %v593_v50  ;;  %v608_v62 = vld [vmem:[#allocation9 + $0x148] sm:$0xff]  ;;  %v629_v32 = vld [vmem:[#allocation9 + $0x1f0] sm:$0xff]  ;;  %v638_v38 = vld [vmem:[#allocation9 + $0x238] sm:$0xff] }
 0x144   :  { %1258 = vmatprep.subr.bf16.mxu1 %v1257_v3  ;;  %v1281_v1 = vpack.c.bf16 %v612_v63, %v608_v62  ;;  %v607_v3 = vld [vmem:[#allocation9 + $0x140] sm:$0xff]  ;;  %v1355_v33 = vpack.c.bf16 %v629_v32, %v625_v31  ;;  %v1357_v41 = vpack.c.bf16 %v638_v38, %v634_v36  ;;  %v633_v43 = vld [vmem:[#allocation9 + $0x210] sm:$0xff]  ;;  %v646_v50 = vld [vmem:[#allocation9 + $0x278] sm:$0xff] }
 0x145   :  { %1196 = vmatpush1.bf16.msra.mxu0 %v1195_v61  ;;  %v1343_v61 = vpack.c.bf16 %v605_v60, %v601_v58  ;;  %v1283_v6 = vpack.c.bf16 %v611_v4, %v607_v3  ;;  %v637_v44 = vld [vmem:[#allocation9 + $0x230] sm:$0xff]  ;;  %v639_v51 = vld [vmem:[#allocation9 + $0x240] sm:$0xff]  ;;  %v648_v58 = vld [vmem:[#allocation9 + $0x288] sm:$0xff] }
 0x146   :  { %1262 = vmatprep.subr.bf16.mxu0 %v1261_v0  ;;  %v610_v0 = vld [vmem:[#allocation9 + $0x158] sm:$0xff]  ;;  %v1359_v45 = vpack.c.bf16 %v637_v44, %v633_v43  ;;  %v645_v56 = vld [vmem:[#allocation9 + $0x270] sm:$0xff]  ;;  %v647_v63 = vld [vmem:[#allocation9 + $0x280] sm:$0xff] }
 0x147   :  { %1260 = vmatpush1.bf16.msra.mxu1 %v1259_v11  ;;  %v1345_v5 = vpack.c.bf16 %v614_v2, %v610_v0  ;;  %v620_v11 = vld [vmem:[#allocation9 + $0x1a8] sm:$0xff]  ;;  %v650_v60 = vld [vmem:[#allocation9 + $0x298] sm:$0xff]  ;;  %v651_v0 = vld [vmem:[#allocation9 + $0x2a0] sm:$0xff] }
 0x148   :  { %460 = vmatmul.mubr.f32.vlgmr.msra.gmra.mrb[0].mxu0 %v242_v9  ;;  %1326 = vmatprep.subr.bf16.mxu1 %v1325_v16  ;;  %v619_v16 = vld [vmem:[#allocation9 + $0x1a0] sm:$0xff]  ;;  %v654_v62 = vld [vmem:[#allocation9 + $0x2b8] sm:$0xff]  ;;  %v1303_v2 = vpack.c.bf16 %v651_v0, %v647_v63  ;;  %v649_v3 = vld [vmem:[#allocation9 + $0x290] sm:$0xff] }
 0x149   :  { %1264 = vmatpush1.bf16.msra.mxu0 %v1263_v10  ;;  %v616_v10 = vld [vmem:[#allocation9 + $0x188] sm:$0xff]  ;;  %v1287_v18 = vpack.c.bf16 %v619_v16, %v615_v15  ;;  %v653_v4 = vld [vmem:[#allocation9 + $0x2b0] sm:$0xff]  ;;  %v666_v20 = vld [vmem:[#allocation9 + $0x318] sm:$0xff] }
 0x14a   :  { %1266 = vmatprep.subr.bf16.mxu0 %v1265_v13  ;;  %531 = vmatmul.mubr.f32.vlgmr.msra.gmra.mrb[0].mxu1 %v242_v9  ;;  %v1347_v9 = vpack.c.bf16 %v613_v8, %v609_v7  ;;  %v1285_v13 = vpack.c.bf16 %v620_v11, %v616_v10  ;;  %v660_v7 = vld [vmem:[#allocation9 + $0x2e8] sm:$0xff]  ;;  %v658_v8 = vld [vmem:[#allocation9 + $0x2d8] sm:$0xff]  ;;  %v655_v11 = vld [vmem:[#allocation9 + $0x2c0] sm:$0xff] }
 0x14b   :  { %1328 = vmatpush1.bf16.msra.mxu1 %v1327_v23  ;;  %v628_v23 = vld [vmem:[#allocation9 + $0x1e8] sm:$0xff]  ;;  %v662_v10 = vld [vmem:[#allocation9 + $0x2f8] sm:$0xff]  ;;  %v1307_v14 = vpack.c.bf16 %v659_v12, %v655_v11  ;;  %v657_v15 = vld [vmem:[#allocation9 + $0x2d0] sm:$0xff] }
 0x14c   :  { %1330 = vmatprep.subr.bf16.mxu1 %v1329_v28  ;;  %v627_v28 = vld [vmem:[#allocation9 + $0x1e0] sm:$0xff]  ;;  %v661_v16 = vld [vmem:[#allocation9 + $0x2f0] sm:$0xff]  ;;  %v668_v19 = vld [vmem:[#allocation9 + $0x328] sm:$0xff] }
 0x14d   :  { %1268 = vmatpush1.bf16.msra.mxu0 %v1267_v22  ;;  %v624_v22 = vld [vmem:[#allocation9 + $0x1c8] sm:$0xff]  ;;  %v1291_v30 = vpack.c.bf16 %v627_v28, %v623_v27  ;;  %v667_v24 = vld [vmem:[#allocation9 + $0x320] sm:$0xff]  ;;  %v665_v27 = vld [vmem:[#allocation9 + $0x310] sm:$0xff] }
 0x14e   :  { %1270 = vmatprep.subr.bf16.mxu0 %v1269_v25  ;;  %v1289_v25 = vpack.c.bf16 %v628_v23, %v624_v22  ;;  %v670_v22 = vld [vmem:[#allocation9 + $0x338] sm:$0xff]  ;;  %v663_v23 = vld [vmem:[#allocation9 + $0x300] sm:$0xff]  ;;  %v669_v28 = vld [vmem:[#allocation9 + $0x330] sm:$0xff] }
 0x14f   :  { %1332 = vmatpush1.bf16.msra.mxu1 %v1331_v35  ;;  %v636_v35 = vld [vmem:[#allocation9 + $0x228] sm:$0xff]  ;;  %v1311_v26 = vpack.c.bf16 %v667_v24, %v663_v23  ;;  %v674_v32 = vld [vmem:[#allocation9 + $0x358] sm:$0xff]  ;;  %v675_v36 = vld [vmem:[#allocation9 + $0x360] sm:$0xff] }
 0x150   :  { %1334 = vmatprep.subr.bf16.mxu1 %v1333_v40  ;;  %v635_v40 = vld [vmem:[#allocation9 + $0x220] sm:$0xff]  ;;  %v676_v31 = vld [vmem:[#allocation9 + $0x368] sm:$0xff]  ;;  %v682_v44 = vld [vmem:[#allocation9 + $0x398] sm:$0xff] }
 0x151   :  { %1272 = vmatpush1.bf16.msra.mxu0 %v1271_v34  ;;  %v632_v34 = vld [vmem:[#allocation9 + $0x208] sm:$0xff]  ;;  %v1295_v42 = vpack.c.bf16 %v635_v40, %v631_v39  ;;  %v673_v39 = vld [vmem:[#allocation9 + $0x350] sm:$0xff] }
 0x152   :  { %1274 = vmatprep.subr.bf16.mxu0 %v1273_v37  ;;  %v1293_v37 = vpack.c.bf16 %v636_v35, %v632_v34  ;;  %v678_v34 = vld [vmem:[#allocation9 + $0x378] sm:$0xff]  ;;  %v671_v35 = vld [vmem:[#allocation9 + $0x340] sm:$0xff]  ;;  %v677_v40 = vld [vmem:[#allocation9 + $0x370] sm:$0xff] }
 0x153   :  { %1336 = vmatpush1.bf16.msra.mxu1 %v1335_v47  ;;  %v644_v47 = vld [vmem:[#allocation9 + $0x268] sm:$0xff]  ;;  %v1315_v38 = vpack.c.bf16 %v675_v36, %v671_v35  ;;  %v693_v63 = vld [vmem:[#allocation9 + $0x3f0] sm:$0xff] }
 0x154   :  { %1338 = vmatprep.subr.bf16.mxu1 %v1337_v49  ;;  %v684_v43 = vld [vmem:[#allocation9 + $0x3a8] sm:$0xff] }
 0x155   :  { %1276 = vmatpush1.bf16.msra.mxu0 %v1275_v46  ;;  %v640_v46 = vld [vmem:[#allocation9 + $0x248] sm:$0xff] }
 0x156   :  { %1278 = vmatprep.subr.bf16.mxu0 %v1277_v48  ;;  %v642_v48 = vld [vmem:[#allocation9 + $0x258] sm:$0xff]  ;;  %v1297_v49 = vpack.c.bf16 %v644_v47, %v640_v46 }
 0x157   :  { %1340 = vmatpush1.bf16.msra.mxu1 %v1339_v54  ;;  %v1361_v53 = vpack.c.bf16 %v646_v50, %v642_v48  ;;  %v1299_v54 = vpack.c.bf16 %v643_v52, %v639_v51  ;;  %v679_v48 = vld [vmem:[#allocation9 + $0x380] sm:$0xff]  ;;  %v681_v50 = vld [vmem:[#allocation9 + $0x390] sm:$0xff] }
 0x158   :  { %1342 = vmatprep.subr.bf16.mxu1 %v1341_v55  ;;  %v641_v55 = vld [vmem:[#allocation9 + $0x250] sm:$0xff] }
 0x159   :  { %1280 = vmatpush1.bf16.msra.mxu0 %v1279_v59  ;;  %v1363_v57 = vpack.c.bf16 %v645_v56, %v641_v55  ;;  %v652_v59 = vld [vmem:[#allocation9 + $0x2a8] sm:$0xff]  ;;  %v685_v52 = vld [vmem:[#allocation9 + $0x3b0] sm:$0xff] }
 0x15a   :  { %1282 = vmatprep.subr.bf16.mxu0 %v1281_v1  ;;  %v1365_v1 = vpack.c.bf16 %v654_v62, %v650_v60  ;;  %v1383_v55 = vpack.c.bf16 %v685_v52, %v681_v50  ;;  %v689_v62 = vld [vmem:[#allocation9 + $0x3d0] sm:$0xff]  ;;  %v891_v50 = vld [vmem:[#allocation11 + $0x20] sm:$0xff] }
 0x15b   :  { %1344 = vmatpush1.bf16.msra.mxu1 %v1343_v61  ;;  %v1301_v61 = vpack.c.bf16 %v652_v59, %v648_v58  ;;  %v694_v58 = vld [vmem:[#allocation9 + $0x3f8] sm:$0xff]  ;;  %v687_v59 = vld [vmem:[#allocation9 + $0x3c0] sm:$0xff] }
 0x15c   :  { %1346 = vmatprep.subr.bf16.mxu1 %v1345_v5  ;;  %v1367_v5 = vpack.c.bf16 %v653_v4, %v649_v3  ;;  %v375_v3 = vlaneseq }
 0x15d   :  { %1284 = vmatpush1.bf16.msra.mxu0 %v1283_v6  ;;  %v656_v6 = vld [vmem:[#allocation9 + $0x2c8] sm:$0xff] }
 0x15e   :  { %1286 = vmatprep.subr.bf16.mxu0 %v1285_v13  ;;  %v1369_v13 = vpack.c.bf16 %v662_v10, %v658_v8  ;;  %v2056_v4 = vshrl.u32 %v375_v3, 7 }
 0x15f   :  { %1348 = vmatpush1.bf16.msra.mxu1 %v1347_v9  ;;  %v1305_v9 = vpack.c.bf16 %v660_v7, %v656_v6  ;;  %v373_v6 = vld [vmem:[%s2124_s5] sm:$0xf] }
 0x160   :  { %1350 = vmatprep.subr.bf16.mxu1 %v1349_v17  ;;  %v1371_v17 = vpack.c.bf16 %v661_v16, %v657_v15  ;;  %v2065_v7 = vsub.s32 1, %v2056_v4  ;;  %v389_v10 = vsub.s32 3, %v2056_v4 }
 0x161   :  { %1288 = vmatpush1.bf16.msra.mxu0 %v1287_v18  ;;  %v664_v18 = vld [vmem:[#allocation9 + $0x308] sm:$0xff] }
 0x162   :  { %1290 = vmatprep.subr.bf16.mxu0 %v1289_v25  ;;  %v1373_v25 = vpack.c.bf16 %v670_v22, %v666_v20  ;;  %v390_v16 = vrot.slane %v373_v6, %v389_v10 }
 0x163   :  { %1352 = vmatpush1.bf16.msra.mxu1 %v1351_v21  ;;  %v1309_v21 = vpack.c.bf16 %v668_v19, %v664_v18  ;;  %v385_v18 = vsub.s32 2, %v2056_v4 }
 0x164   :  { %1354 = vmatprep.subr.bf16.mxu1 %v1353_v29  ;;  %v1375_v29 = vpack.c.bf16 %v669_v28, %v665_v27 }
 0x165   :  { %1292 = vmatpush1.bf16.msra.mxu0 %v1291_v30  ;;  %v672_v30 = vld [vmem:[#allocation9 + $0x348] sm:$0xff]  ;;  %v386_v22 = vrot.slane %v373_v6, %v385_v18 }
 0x166   :  { %1294 = vmatprep.subr.bf16.mxu0 %v1293_v37  ;;  %v1377_v37 = vpack.c.bf16 %v678_v34, %v674_v32 }
 0x167   :  { %1356 = vmatpush1.bf16.msra.mxu1 %v1355_v33  ;;  %v1313_v33 = vpack.c.bf16 %v676_v31, %v672_v30  ;;  %v244_v31 = vld [vmem:[%s2122_s3] sm:$0xff] }
 0x168   :  { %1358 = vmatprep.subr.bf16.mxu1 %v1357_v41  ;;  %v680_v41 = vld [vmem:[#allocation9 + $0x388] sm:$0xff] }
 0x169   :  { %1296 = vmatpush1.bf16.msra.mxu0 %v1295_v42  ;;  %v1379_v42 = vpack.c.bf16 %v677_v40, %v673_v39  ;;  %v1317_v46 = vpack.c.bf16 %v684_v43, %v680_v41  ;;  %v888_v41 = vld [vmem:[#allocation11 + $0x8] sm:$0xff] }
 0x16a   :  { %1298 = vmatprep.subr.bf16.mxu0 %v1297_v49  ;;  %v683_v49 = vld [vmem:[#allocation9 + $0x3a0] sm:$0xff] }
 0x16b   :  { %1360 = vmatpush1.bf16.msra.mxu1 %v1359_v45  ;;  %v686_v45 = vld [vmem:[#allocation9 + $0x3b8] sm:$0xff]  ;;  %v1319_v51 = vpack.c.bf16 %v683_v49, %v679_v48 }
 0x16c   :  { %1362 = vmatprep.subr.bf16.mxu1 %v1361_v53  ;;  %v1381_v47 = vpack.c.bf16 %v686_v45, %v682_v44  ;;  %v688_v53 = vld [vmem:[#allocation9 + $0x3c8] sm:$0xff]  ;;  %v887_v44 = vld [vmem:[#allocation11] sm:$0xff]  ;;  %v889_v45 = vld [vmem:[#allocation11 + $0x10] sm:$0xff] }
 0x16d   :  { %1300 = vmatpush1.bf16.msra.mxu0 %v1299_v54  ;;  %v692_v54 = vld [vmem:[#allocation9 + $0x3e8] sm:$0xff]  ;;  %v894_v48 = vld [vmem:[#allocation11 + $0x38] sm:$0xff] }
 0x16e   :  { %1302 = vmatprep.subr.bf16.mxu0 %v1301_v61  ;;  %v1321_v56 = vpack.c.bf16 %v692_v54, %v688_v53  ;;  %v691_v61 = vld [vmem:[#allocation9 + $0x3e0] sm:$0xff]  ;;  %v896_v53 = vld [vmem:[#allocation11 + $0x48] sm:$0xff]  ;;  %v898_v54 = vld [vmem:[#allocation11 + $0x58] sm:$0xff] }
 0x16f   :  { %1364 = vmatpush1.bf16.msra.mxu1 %v1363_v57  ;;  %v690_v57 = vld [vmem:[#allocation9 + $0x3d8] sm:$0xff]  ;;  %v1323_v0 = vpack.c.bf16 %v691_v61, %v687_v59  ;;  %v900_v59 = vld [vmem:[#allocation11 + $0x68] sm:$0xff] }
 0x170   :  { %1366 = vmatprep.subr.bf16.mxu1 %v1365_v1  ;;  %v1385_v60 = vpack.c.bf16 %v694_v58, %v690_v57  ;;  %v1118_v1 = vld [vmem:[%s2121_s2 + $0x8] sm:$0xff]  ;;  %v897_v57 = vld [vmem:[#allocation11 + $0x50] sm:$0xff] }
 0x171   :  { %1304 = vmatpush1.bf16.msra.mxu0 %v1303_v2  ;;  %v1387_v2 = vpack.c.bf16 %v693_v63, %v689_v62  ;;  %781 = vmatprep.mubr.f32.mxu0 %v1118_v1  ;;  %v899_v62 = vld [vmem:[#allocation11 + $0x60] sm:$0xff]  ;;  %v901_v63 = vld [vmem:[#allocation11 + $0x70] sm:$0xff] }
 0x172   :  { %1306 = vmatprep.subr.bf16.mxu0 %v1305_v9  ;;  %852 = vmatprep.mubr.f32.mxu1 %v1118_v1  ;;  %v382_v9 = vrot.slane %v373_v6, %v2065_v7  ;;  %v904_v1 = vld [vmem:[#allocation11 + $0x88] sm:$0xff] }
 0x173   :  { %1368 = vmatpush1.bf16.msra.mxu1 %v1367_v5  ;;  %v2059_v5 = vsub.s32 0, %v2056_v4 }
 0x174   :  { %1370 = vmatprep.subr.bf16.mxu1 %v1369_v13 }
 0x175   :  { %1308 = vmatpush1.bf16.msra.mxu0 %v1307_v14  ;;  %v378_v8 = vrot.slane %v373_v6, %v2059_v5  ;;  %v903_v6 = vld [vmem:[#allocation11 + $0x80] sm:$0xff] }
 0x176   :  { %1310 = vmatprep.subr.bf16.mxu0 %v1309_v21 }
 0x177   :  { %1372 = vmatpush1.bf16.msra.mxu1 %v1371_v17 }
 0x178   :  { %1374 = vmatprep.subr.bf16.mxu1 %v1373_v25 }
 0x179   :  { %1312 = vmatpush1.bf16.msra.mxu0 %v1311_v26 }
 0x17a   :  { %1314 = vmatprep.subr.bf16.mxu0 %v1313_v33 }
 0x17b   :  { %1376 = vmatpush1.bf16.msra.mxu1 %v1375_v29 }
 0x17c   :  { %1378 = vmatprep.subr.bf16.mxu1 %v1377_v37 }
 0x17d   :  { %1316 = vmatpush1.bf16.msra.mxu0 %v1315_v38 }
 0x17e   :  { %1318 = vmatprep.subr.bf16.mxu0 %v1317_v46  ;;  %v1391_v46 = vpack.c.bf16 %v889_v45, %v887_v44 }
 0x17f   :  { %1380 = vmatpush1.bf16.msra.mxu1 %v1379_v42  ;;  %v890_v42 = vld [vmem:[#allocation11 + $0x18] sm:$0xff] }
 0x180   :  { %1382 = vmatprep.subr.bf16.mxu1 %v1381_v47  ;;  %v1389_v43 = vpack.c.bf16 %v890_v42, %v888_v41  ;;  %v892_v47 = vld [vmem:[#allocation11 + $0x28] sm:$0xff] }
 0x181   :  { %1320 = vmatpush1.bf16.msra.mxu0 %v1319_v51  ;;  %v1393_v49 = vpack.c.bf16 %v894_v48, %v892_v47  ;;  %v893_v51 = vld [vmem:[#allocation11 + $0x30] sm:$0xff] }
 0x182   :  { %1322 = vmatprep.subr.bf16.mxu0 %v1321_v56  ;;  %v1395_v52 = vpack.c.bf16 %v893_v51, %v891_v50  ;;  %v895_v56 = vld [vmem:[#allocation11 + $0x40] sm:$0xff] }
 0x183   :  { %1384 = vmatpush1.bf16.msra.mxu1 %v1383_v55  ;;  %v1397_v55 = vpack.c.bf16 %v898_v54, %v896_v53  ;;  %v1399_v58 = vpack.c.bf16 %v897_v57, %v895_v56 }
 0x184   :  { %1386 = vmatprep.subr.bf16.mxu1 %v1385_v60  ;;  %v902_v60 = vld [vmem:[#allocation11 + $0x78] sm:$0xff] }
 0x185   :  { %1324 = vmatpush1.bf16.msra.mxu0 %v1323_v0  ;;  %v1401_v61 = vpack.c.bf16 %v902_v60, %v900_v59  ;;  %v1403_v0 = vpack.c.bf16 %v901_v63, %v899_v62  ;;  %v919_v60 = vld [vmem:[%s2128_s9] sm:$0x3] }
 0x186   :  { %1390 = vmatprep.subr.bf16.mxu0 %v1389_v43  ;;  %v928_v62 = vrot.slane %v919_v60, %v2065_v7 }
 0x187   :  { %1388 = vmatpush1.bf16.msra.mxu1 %v1387_v2  ;;  %v906_v2 = vld [vmem:[#allocation11 + $0x98] sm:$0xff] }
 0x188   :  { %v1405_v3 = vpack.c.bf16 %v906_v2, %v904_v1 }
 0x21b   :  { %v461_v11 = vpop.f32.mrb[0].mxu0 }
 0x21c   :  { %v462_v12 = vadd.f32 %v461_v11, %v378_v8  ;;  %v463_v13 = vpop.f32.mrb[1].mxu0  ;;  %v905_v8 = vld [vmem:[#allocation11 + $0x90] sm:$0xff]  ;;  %v908_v11 = vld [vmem:[#allocation11 + $0xa8] sm:$0xff] }
 0x21d   :  { %v464_v14 = vadd.f32 %v463_v13, %v382_v9  ;;  %v532_v19 = vpop.f32.mrb[0].mxu1  ;;  %v1407_v9 = vpack.c.bf16 %v905_v8, %v903_v6 }
 0x21e   :  { %v1115_v15 = vmul.f32 -1.442695, %v462_v12  ;;  %v534_v20 = vpop.f32.mrb[1].mxu1  ;;  %v533_v24 = vadd.f32 %v532_v19, %v386_v22  ;;  %v910_v12 = vld [vmem:[#allocation11 + $0xb8] sm:$0xff]  ;;  %v1803_v22 = vmov 0.0  }
 0x21f   :  { %v1116_v17 = vmul.f32 -1.442695, %v464_v14  ;;  %v535_v21 = vadd.f32 %v534_v20, %v390_v16  ;;  %v1409_v13 = vpack.c.bf16 %v910_v12, %v908_v11  ;;  %v907_v14 = vld [vmem:[#allocation11 + $0xa0] sm:$0xff]  ;;  %v912_v16 = vld [vmem:[#allocation11 + $0xc8] sm:$0xff]  ;;  %v914_v19 = vld [vmem:[#allocation11 + $0xd8] sm:$0xff] }
 0x220   :  { %1439 = vpow2.f32 %v1115_v15  ;;  %v909_v15 = vld [vmem:[#allocation11 + $0xb0] sm:$0xff]  ;;  %v911_v20 = vld [vmem:[#allocation11 + $0xc0] sm:$0xff] }
 0x221   :  { %1441 = vpow2.f32 %v1116_v17  ;;  %v1117_v23 = vmul.f32 -1.442695, %v535_v21  ;;  %v1411_v17 = vpack.c.bf16 %v909_v15, %v907_v14  ;;  %v913_v21 = vld [vmem:[#allocation11 + $0xd0] sm:$0xff] }
 0x223   :  { %1443 = vpow2.f32 %v1117_v23  ;;  %v1413_v23 = vpack.c.bf16 %v914_v19, %v912_v16 }
 0x224   :  { %1445 = vtanh.f32 %v533_v24  ;;  %v916_v24 = vld [vmem:[#allocation11 + $0xe8] sm:$0xff] }
 0x22a   :  { %v1440_v25 = vpop.eup %1439 }
 0x22b   :  { %v1442_v26 = vpop.eup %1441  ;;  %v540_v27 = vadd.f32 1.0, %v1440_v25  ;;  %v918_v25 = vld [vmem:[#allocation11 + $0xf8] sm:$0xff] }
 0x22c   :  { %v546_v28 = vadd.f32 1.0, %v1442_v26  ;;  %v1415_v26 = vpack.c.bf16 %v913_v21, %v911_v20 }
 0x22d   :  { %1447 = vrcp.f32 %v540_v27  ;;  %v1444_v29 = vpop.eup %1443  ;;  %v1417_v27 = vpack.c.bf16 %v918_v25, %v916_v24 }
 0x22e   :  { %1449 = vrcp.f32 %v546_v28  ;;  %v1446_v30 = vpop.eup %1445  ;;  %v553_v33 = vadd.f32 1.0, %v1444_v29  ;;  %v915_v28 = vld [vmem:[#allocation11 + $0xe0] sm:$0xff]  ;;  %v917_v29 = vld [vmem:[#allocation11 + $0xf0] sm:$0xff] }
 0x230   :  { %1451 = vrcp.f32 %v553_v33 }
 0x237   :  { %v1448_v32 = vpop.eup %1447 }
 0x238   :  { %v1450_v34 = vpop.eup %1449  ;;  %v557_v35 = vmul.f32 %v1448_v32, %v1446_v30  ;;  %v1419_v30 = vpack.c.bf16 %v917_v29, %v915_v28 }
 0x239   :  { %v556_v36 = vmul.f32 %v1450_v34, %v244_v31  ;;  %v695_v31 = vld [vmem:[%s2126_s7] sm:$0xf] }
 0x23a   :  { %v1452_v38 = vpop.eup %1451  ;;  %v700_v32 = vrot.slane %v695_v31, %v2059_v5  ;;  %v704_v33 = vrot.slane %v695_v31, %v2065_v7  ;;  %v712_v42 = vrot.slane %v695_v31, %v389_v10  ;;  %v708_v44 = vrot.slane %v695_v31, %v385_v18 }
 0x23b   :  { %v558_v37 = vadd.f32 %v557_v35, %v556_v36 }
 0x23d   :  { %1453 = vtanh.f32 %v558_v37  ;;  %562 = vst [vmem:[%s2131_s12] sm:$0xff] %v558_v37 }
 0x244   :  { %v1119_v10 = vld [vmem:[%s2122_s3 + $0x8] sm:$0xff] }
 0x247   :  { %v1454_v39 = vpop.eup %1453 }
 0x248   :  { %v560_v40 = vmul.f32 %v1454_v39, %v1452_v38 }
 0x24a   :  { %561 = vst [vmem:[%s2130_s11] sm:$0xff] %v560_v40  ;;  %782 = vmatmul.mubr.f32.vlgmr.msra.gmra.mrb[2].mxu0 %v560_v40  ;;  %853 = vmatmul.mubr.f32.vlgmr.msra.gmra.mrb[2].mxu1 %v560_v40 }
 0x24b   :  { %1392 = vmatpush1.bf16.msra.mxu0 %v1391_v46  ;;  %995 = vmatprep.mubr.f32.mxu0 %v1803_v22 }
 0x24c   :  { %1394 = vmatprep.subr.bf16.mxu0 %v1393_v49 }
 0x24f   :  { %1396 = vmatpush1.bf16.msra.mxu0 %v1395_v52 }
 0x250   :  { %1398 = vmatprep.subr.bf16.mxu0 %v1397_v55 }
 0x253   :  { %1400 = vmatpush1.bf16.msra.mxu0 %v1399_v58 }
 0x254   :  { %1402 = vmatprep.subr.bf16.mxu0 %v1401_v61  ;;  %v924_v61 = vrot.slane %v919_v60, %v2059_v5 }
 0x257   :  { %1404 = vmatpush1.bf16.msra.mxu0 %v1403_v0 }
 0x258   :  { %1406 = vmatprep.subr.bf16.mxu0 %v1405_v3 }
 0x25b   :  { %1408 = vmatpush1.bf16.msra.mxu0 %v1407_v9 }
 0x25c   :  { %1410 = vmatprep.subr.bf16.mxu0 %v1409_v13 }
 0x25f   :  { %1412 = vmatpush1.bf16.msra.mxu0 %v1411_v17 }
 0x260   :  { %1414 = vmatprep.subr.bf16.mxu0 %v1413_v23 }
 0x263   :  { %1416 = vmatpush1.bf16.msra.mxu0 %v1415_v26 }
 0x264   :  { %1418 = vmatprep.subr.bf16.mxu0 %v1417_v27 }
 0x267   :  { %1420 = vmatpush1.bf16.msra.mxu0 %v1419_v30 }
 0x31d   :  { %v783_v34 = vpop.f32.mrb[2].mxu0  ;;  %v854_v35 = vpop.f32.mrb[2].mxu1 }
 0x31e   :  { %v784_v36 = vadd.f32 %v783_v34, %v700_v32  ;;  %v785_v37 = vpop.f32.mrb[3].mxu0  ;;  %v856_v38 = vpop.f32.mrb[3].mxu1  ;;  %v855_v46 = vadd.f32 %v854_v35, %v708_v44 }
 0x31f   :  { %v786_v39 = vadd.f32 %v785_v37, %v704_v33  ;;  %v857_v43 = vadd.f32 %v856_v38, %v712_v42 }
 0x320   :  { %v1120_v40 = vmul.f32 -1.442695, %v784_v36 }
 0x321   :  { %v1121_v41 = vmul.f32 -1.442695, %v786_v39  ;;  %v1122_v45 = vmul.f32 -1.442695, %v857_v43 }
 0x322   :  { %1455 = vpow2.f32 %v1120_v40 }
 0x323   :  { %1457 = vpow2.f32 %v1121_v41 }
 0x324   :  { %1459 = vpow2.f32 %v1122_v45 }
 0x325   :  { %1461 = vtanh.f32 %v855_v46 }
 0x32c   :  { %v1456_v47 = vpop.eup %1455 }
 0x32d   :  { %v1458_v48 = vpop.eup %1457  ;;  %v862_v49 = vadd.f32 1.0, %v1456_v47 }
 0x32e   :  { %v868_v50 = vadd.f32 1.0, %v1458_v48  ;;  %v1460_v51 = vpop.eup %1459 }
 0x32f   :  { %1463 = vrcp.f32 %v862_v49  ;;  %v1462_v52 = vpop.eup %1461  ;;  %v875_v18 = vadd.f32 1.0, %v1460_v51 }
 0x330   :  { %1465 = vrcp.f32 %v868_v50 }
 0x331   :  { %1467 = vrcp.f32 %v875_v18 }
 0x339   :  { %v1464_v53 = vpop.eup %1463 }
 0x33a   :  { %v1466_v54 = vpop.eup %1465  ;;  %v879_v4 = vmul.f32 %v1464_v53, %v1462_v52 }
 0x33b   :  { %v878_v55 = vmul.f32 %v1466_v54, %v1119_v10  ;;  %v1468_v57 = vpop.eup %1467 }
 0x33d   :  { %v880_v56 = vadd.f32 %v879_v4, %v878_v55 }
 0x33f   :  { %1124 = vst [vmem:[%s2131_s12 + $0x8] sm:$0xff] %v880_v56  ;;  %1469 = vtanh.f32 %v880_v56  ;;  %s1741_s12 = scalar_lea.vmem %s1011_s0, 256 }
 0x340   :  { %p1742_p13 = scmp.ne.s32.totalorder %s1011_s0, %s1741_s12  ;;  %p1747_p1 = scmp.lt.s32.totalorder %s1741_s12, %s1741_s12 }
 0x342   :  { %p1748_p2 = por %p1747_p1, %p1746_p0 }
 0x344   :  { %p1749_p3 = pnand %p1748_p2, %p1742_p13 }
 0x349   :  { %v1470_v58 = vpop.eup %1469 }
 0x34a   :  { %v882_v59 = vmul.f32 %v1470_v58, %v1468_v57 }
 0x34c   :  { %1123 = vst [vmem:[%s2130_s11 + $0x8] sm:$0xff] %v882_v59  ;;  %996 = vmatmul.mubr.f32.vlgmr.msra.gmra.mrb[4].mxu0 %v882_v59 }
 0x41f   :  { %v997_v63 = vpop.f32.mrb[4].mxu0 }
 0x420   :  { %v998_v0 = vadd.f32 %v997_v63, %v924_v61  ;;  %v999_v1 = vpop.f32.mrb[5].mxu0 }
 0x421   :  { %v1000_v2 = vadd.f32 %v999_v1, %v928_v62 }
 0x422   :  { %1002 = vst [vmem:[#allocation12] sm:$0xff] %v998_v0 }
 0x423   :  { %1003 = vst [vmem:[#allocation12 + $0x8] sm:$0xff] %v1000_v2 }
 0x424   :  { %1752 = shalt.err (!%p1749_p3)
}
 0x425   :  { %s1753_s16 = scalar_lea.hbm %s2129_s10, 256 }
 0x426   :  { %p1754_p4 = scmp.ne.s32.totalorder %s2129_s10, %s1753_s16  ;;  %p1757_p5 = scmp.lt.u32.totalorder %s1753_s16, %s2129_s10 }
 0x428   :  { %p1759_p6 = pnand %p1757_p5, %p1754_p4 }
 0x42a   :  { %1762 = shalt.err (!%p1759_p6)
}
 0x42b   :  { %1013 = dma.vmem_to_hbm [thread:$0]  %s1011_s0, 256, %s2129_s10, [#allocation6]  }
 0x42c   :  { %1785 = dma.done.wait [#allocation6], 256  }
 0x42d   :  { %1786 = vsyncadd [#allocation6], 4294967040 }
 0x42e   :  { %1025 = vsyncpa [#allocation5], 1 }
 0x42f   :  { %1026 = vsyncpa [#allocation10], 1 }
 0x430   :  { %1027 = vsyncpa [#allocation6], 1 }
 0x431   :  { %1028 = vsyncpa [#allocation7], 1 }
 0x432   :  { %1029 = vsyncmov [#allocation3] }
 0x435   :  { %s1030_s21 = vpop.sfrf %1029 }
 0x436   :  { %p1125_p7 = scmp.ne.s32.totalorder %s1030_s21, 0 }
 0x438   :  { %1034 = shalt.err (%p1125_p7)  }
 0x439   :  { %1036 = vsyncmov [#allocation3 + $0x1] }
 0x43c   :  { %s1037_s23 = vpop.sfrf %1036 }
 0x43d   :  { %p1126_p8 = scmp.ne.s32.totalorder %s1037_s23, 0 }
 0x43f   :  { %1041 = shalt.err (%p1126_p8)  }
 0x440   :  { %1043 = vsyncmov [#allocation3 + $0x2] }
 0x443   :  { %s1044_s2 = vpop.sfrf %1043 }
 0x444   :  { %p1127_p9 = scmp.ne.s32.totalorder %s1044_s2, 0 }
 0x446   :  { %1048 = shalt.err (%p1127_p9)  }
 0x447   :  { %1050 = vsyncmov [#allocation3 + $0x3] }
 0x44a   :  { %s1051_s10 = vpop.sfrf %1050 }
 0x44b   :  { %p1128_p10 = scmp.ne.s32.totalorder %s1051_s10, 0 }
 0x44d   :  { %1055 = shalt.err (%p1128_p10)  }
 0x44e   :  { %1057 = vsyncmov [#allocation3 + $0x4] }
 0x451   :  { %s1058_s5 = vpop.sfrf %1057 }
 0x452   :  { %p1129_p11 = scmp.ne.s32.totalorder %s1058_s5, 0 }
 0x454   :  { %1062 = shalt.err (%p1129_p11)  }
 0x455   :  { %1064 = vsyncmov [#allocation3 + $0x5] }
 0x458   :  { %s1065_s15 = vpop.sfrf %1064 }
 0x459   :  { %p1130_p12 = scmp.ne.s32.totalorder %s1065_s15, 0 }
 0x45b   :  { %1069 = shalt.err (%p1130_p12)  }
 0x45c   :  { %1071 = vsyncmov [#allocation3 + $0x6] }
 0x45f   :  { %s1072_s22 = vpop.sfrf %1071 }
 0x460   :  { %p1131_p13 = scmp.ne.s32.totalorder %s1072_s22, 0 }
 0x462   :  { %1076 = shalt.err (%p1131_p13)  }
 0x463   :  { %1078 = vsyncmov [#allocation3 + $0x7] }
 0x466   :  { %s1079_s25 = vpop.sfrf %1078 }
 0x467   :  { %p1132_p0 = scmp.ne.s32.totalorder %s1079_s25, 0 }
 0x469   :  { %1083 = shalt.err (%p1132_p0)  }

</bundles_post_ra>
